<compile_context>
chip_gen: v7x
topology: tpu7x:2x2x1
jax: 0.10.0
libtpu: 0.0.40
codegen_flags: <defaults>
</compile_context>

<pallas_src>
import functools

import jax
import jax.numpy as jnp
from jax.experimental import pallas as pl
from jax.experimental.pallas import tpu as pltpu


def pack_bf16_pairs(table):
    """Pack an (R, H) float table into (R, H//2) uint32 of bf16 pairs.

    Column j (j < H//2) is stored, rounded to bf16, in the LOW 16 bits of word
    j; column j + H//2 in the HIGH 16 bits.  The kernel unpacks with shift /
    mask + same-width bitcast (bf16 bits in the top half of an f32 word ARE
    the f32 upcast), so the round trip is bit-exact vs. bf16 -> f32.
    """
    r, h = table.shape
    assert h % 2 == 0, "hidden size must be even for bf16 pair packing"
    t = table.astype(jnp.bfloat16)
    lo = jax.lax.bitcast_convert_type(t[:, : h // 2], jnp.uint16).astype(jnp.uint32)
    hi = jax.lax.bitcast_convert_type(t[:, h // 2:], jnp.uint16).astype(jnp.uint32)
    return (hi << 16) | lo


def prepare_params(word_emb, pos_emb, type_emb, gamma, beta):
    """One-time model prep: bf16-pack the big tables (word + position)."""
    return {
        "word_packed": pack_bf16_pairs(word_emb),   # (V, H//2) uint32
        "pos_packed": pack_bf16_pairs(pos_emb),     # (P, H//2) uint32
        "type_emb": type_emb.astype(jnp.float32),   # (T, H)
        "gamma": gamma.astype(jnp.float32),         # (1, H)
        "beta": beta.astype(jnp.float32),           # (1, H)
    }


def bert_embeddings_kernel(ids_smem, word_hbm, pos_ref, type_ref, tt_ref,
                           gamma_ref, beta_ref, out_ref, wbuf, sem, *, eps):
    # ids_smem : (N,)       int32  SMEM (scalar prefetch) -- flattened token ids
    # word_hbm : (V, Hp)    uint32 raw HBM ref (bf16-pair packed word table)
    # pos_ref  : (tn, Hp)   uint32 packed position slab for this sequence tile
    # type_ref : (T, H)     f32    full token-type table (tiny, VMEM resident)
    # tt_ref   : (tn, 1)    int32  token-type ids for this tile
    # gamma/beta:(1, H)     f32    LayerNorm affine
    # out_ref  : (tn, H)    f32
    # wbuf     : (2*tn, Hp) uint32 2-slot scratch for gathered word rows
    # sem      : (2,) DMA semaphores, one per slot
    tn = out_ref.shape[0]
    unroll = tn if tn <= 32 else 8

    n_si = pl.num_programs(0)            # sequence tiles (outer axis)
    n_b = pl.num_programs(1)             # batch (inner axis)
    si = pl.program_id(0)
    b = pl.program_id(1)
    step = si * n_b + b                  # flat sequential grid step
    num_steps = n_si * n_b
    slot = step & 1

    def issue_gather(tile_idx, slot_idx):
        # tile_idx = flat row-block index of the (N, H) output; its token ids
        # start at tile_idx * tn in ids_smem.
        base = tile_idx * tn
        row0 = slot_idx * tn
        def body(j, carry):
            tok = ids_smem[base + j]
            pltpu.make_async_copy(
                word_hbm.at[pl.ds(tok, 1), :],
                wbuf.at[pl.ds(row0 + j, 1), :],
                sem.at[slot_idx],
            ).start()
            return carry
        jax.lax.fori_loop(0, tn, body, 0, unroll=unroll)

    # Prime: the very first grid step gathers its own rows into slot 0.
    @pl.when(step == 0)
    def _():
        issue_gather(b * n_si + si, 0)

    # Cross-step software pipeline: kick off the NEXT tile's gather into the
    # other slot before waiting on the current one, so the gather latency
    # overlaps this step's unpack + LayerNorm + output writeback.
    @pl.when(step + 1 < num_steps)
    def _():
        wrap = (b + 1) == n_b
        b_nxt = jnp.where(wrap, 0, b + 1)
        si_nxt = jnp.where(wrap, si + 1, si)
        issue_gather(b_nxt * n_si + si_nxt, 1 - slot)

    # One aggregate wait sized to the whole tile: DMA waits count bytes, and
    # tn rows x Hp u32 equals the sum of this slot's tn per-row copies.
    row_start = pl.multiple_of(slot * tn, tn)
    pltpu.make_async_copy(
        word_hbm.at[pl.ds(0, tn), :],
        wbuf.at[pl.ds(row_start, tn), :],
        sem.at[slot],
    ).wait()

    # --- unpack bf16 pairs to f32 and add word + position -------------------
    hi_mask = jnp.uint32(0xFFFF0000)
    u_w = wbuf[pl.ds(row_start, tn), :]               # (tn, Hp) uint32
    u_p = pos_ref[...]                                # (tn, Hp) uint32
    w_lo = pltpu.bitcast(u_w << 16, jnp.float32)      # columns [0, H/2)
    w_hi = pltpu.bitcast(u_w & hi_mask, jnp.float32)  # columns [H/2, H)
    p_lo = pltpu.bitcast(u_p << 16, jnp.float32)
    p_hi = pltpu.bitcast(u_p & hi_mask, jnp.float32)
    emb = jnp.concatenate([w_lo + p_lo, w_hi + p_hi], axis=-1)   # (tn, H) f32

    # --- token-type embeddings -----------------------------------------------
    type_tab = type_ref[...]                          # (T, H) f32
    if type_tab.shape[0] == 2:
        # T == 2: single FMA  emb += tab0 + tt * (tab1 - tab0)
        tt = tt_ref[...].astype(jnp.float32)          # (tn, 1), values in {0, 1}
        emb = emb + (type_tab[0:1, :] + tt * (type_tab[1:2, :] - type_tab[0:1, :]))
    else:
        tt = tt_ref[...]                              # (tn, 1) int32
        for t in range(type_tab.shape[0]):            # tiny T: unrolled selects
            emb = emb + jnp.where(tt == t, type_tab[t:t + 1, :], 0.0)

    # --- LayerNorm over hidden (biased variance, like torch.nn.LayerNorm) ----
    mean = jnp.mean(emb, axis=-1, keepdims=True)
    centered = emb - mean
    var = jnp.mean(centered * centered, axis=-1, keepdims=True)
    normed = centered * jax.lax.rsqrt(var + eps)
    out = normed * gamma_ref[...] + beta_ref[...]

    # Dropout: eval mode -> identity.
    out_ref[...] = out.astype(out_ref.dtype)


def bert_embeddings(input_ids, token_type_ids, params, *, eps=1e-12,
                    max_tile_tokens=1024):
    """input_ids, token_type_ids: (B, S) int32.  Returns (B, S, H) float32."""
    B, S = input_ids.shape
    word_packed = params["word_packed"]     # (V, H//2) uint32 (bf16 pairs, HBM)
    pos_packed = params["pos_packed"]       # (P, H//2) uint32
    type_emb = params["type_emb"]           # (T, H) f32
    gamma = params["gamma"]                 # (1, H) f32
    beta = params["beta"]                   # (1, H) f32
    V, Hp = word_packed.shape
    T, H = type_emb.shape
    assert Hp * 2 == H
    N = B * S

    if token_type_ids is None:
        token_type_ids = jnp.zeros((B, S), jnp.int32)

    # Token tile: largest power-of-two (<= max_tile_tokens) dividing S, so a
    # tile never crosses a batch row and the position slab stays contiguous.
    tn = 0
    for cand in (1024, 512, 256, 128, 64, 32, 16, 8):
        if cand <= max_tile_tokens and S % cand == 0:
            tn = cand
            break
    if tn == 0:
        raise ValueError(f"sequence length {S} must be a multiple of 8")
    if V < tn:
        raise ValueError("vocab smaller than the token tile is unsupported")
    seq_tiles = S // tn

    ids_flat = input_ids.reshape(N).astype(jnp.int32)          # SMEM scalar prefetch
    tt_flat = token_type_ids.reshape(N, 1).astype(jnp.int32)

    kernel = functools.partial(bert_embeddings_kernel, eps=eps)

    grid_spec = pltpu.PrefetchScalarGridSpec(
        num_scalar_prefetch=1,
        # (seq-tile, batch) with batch innermost: the position-slab block index
        # depends only on the outer axis, so Pallas fetches each slab once
        # instead of re-fetching it for every batch row.
        grid=(seq_tiles, B),
        in_specs=[
            pl.BlockSpec(memory_space=pl.ANY),                    # packed word table (HBM)
            pl.BlockSpec((tn, Hp), lambda si, b, ids: (si, 0)),   # packed position slab
            pl.BlockSpec((T, H), lambda si, b, ids: (0, 0)),      # token-type table
            pl.BlockSpec((tn, 1), lambda si, b, ids: (b * seq_tiles + si, 0)),  # token-type ids
            pl.BlockSpec((1, H), lambda si, b, ids: (0, 0)),      # LN gamma
            pl.BlockSpec((1, H), lambda si, b, ids: (0, 0)),      # LN beta
        ],
        out_specs=pl.BlockSpec((tn, H), lambda si, b, ids: (b * seq_tiles + si, 0)),
        scratch_shapes=[
            pltpu.VMEM((2 * tn, Hp), jnp.uint32),   # 2-slot gathered word rows
            pltpu.SemaphoreType.DMA((2,)),          # one gather semaphore per slot
        ],
    )

    out_flat = pl.pallas_call(
        kernel,
        out_shape=jax.ShapeDtypeStruct((N, H), jnp.float32),
        grid_spec=grid_spec,
        compiler_params=pltpu.CompilerParams(
            # "arbitrary": the cross-step gather prefetch primes only at flat
            # step 0, so the grid must run sequentially on one core.
            # TODO(synk): per-core priming to re-enable v7x megacore sharding.
            dimension_semantics=("arbitrary", "arbitrary"),
            vmem_limit_bytes=48 * 1024 * 1024),
    )(ids_flat, word_packed, pos_packed, type_emb, tt_flat, gamma, beta)

    return out_flat.reshape(B, S, H)


def _reference(input_ids, token_type_ids, word_bf16, pos_bf16, type_emb,
               gamma, beta, eps=1e-12):
    B, S = input_ids.shape
    pos_ids = jnp.arange(S, dtype=jnp.int32)[None, :]
    emb = (word_bf16.astype(jnp.float32)[input_ids]
           + pos_bf16.astype(jnp.float32)[pos_ids]
           + type_emb[token_type_ids])
    mean = jnp.mean(emb, axis=-1, keepdims=True)
    var = jnp.mean((emb - mean) ** 2, axis=-1, keepdims=True)
    normed = (emb - mean) * jax.lax.rsqrt(var + eps)
    return normed * gamma[0] + beta[0]


if __name__ == "__main__":
    # Small synthetic config (H a multiple of 256 keeps the packed halves
    # exactly lane-dense: Hp = H//2 is a multiple of 128).
    vocab_size = 512
    hidden_size = 256
    max_position_embeddings = 64
    type_vocab_size = 2
    layer_norm_eps = 1e-12
    B, S = 2, 16

    key = jax.random.PRNGKey(0)
    k_w, k_p, k_t, k_ids, k_tt = jax.random.split(key, 5)

    word_emb = jax.random.normal(k_w, (vocab_size, hidden_size), jnp.float32) * 0.02
    word_emb = word_emb.at[0].set(0.0)   # nn.Embedding(padding_idx=0)
    pos_emb = jax.random.normal(k_p, (max_position_embeddings, hidden_size), jnp.float32) * 0.02
    type_emb = jax.random.normal(k_t, (type_vocab_size, hidden_size), jnp.float32) * 0.02
    gamma = jnp.ones((1, hidden_size), jnp.float32)
    beta = jnp.zeros((1, hidden_size), jnp.float32)

    params = prepare_params(word_emb, pos_emb, type_emb, gamma, beta)

    input_ids = jax.random.randint(k_ids, (B, S), 0, vocab_size, dtype=jnp.int32)
    token_type_ids = jax.random.randint(k_tt, (B, S), 0, type_vocab_size, dtype=jnp.int32)

    out = bert_embeddings(input_ids, token_type_ids, params, eps=layer_norm_eps)
    out = jax.block_until_ready(out)

    # Reference uses the same bf16-rounded word/position tables the kernel reads.
    ref = _reference(input_ids, token_type_ids,
                     word_emb.astype(jnp.bfloat16), pos_emb.astype(jnp.bfloat16),
                     type_emb, gamma, beta, eps=layer_norm_eps)

    assert out.shape == (B, S, hidden_size)
    max_err = float(jnp.max(jnp.abs(out - ref)))
    assert jnp.allclose(out, ref, atol=2e-5, rtol=2e-5), max_err

    print("KERNEL_OK")
</pallas_src>

<mosaic_0001>
module attributes {stable_mosaic.version = 11 : i64} {
  func.func @bert_embeddings_kernel(%arg0: i32, %arg1: i32, %arg2: memref<32xi32, #tpu.memory_space<smem>>, %arg3: memref<512x128xi32, #tpu.memory_space<any>>, %arg4: memref<16x128xi32, #tpu.memory_space<vmem>>, %arg5: memref<2x256xf32, #tpu.memory_space<vmem>>, %arg6: memref<16x1xi32, #tpu.memory_space<vmem>>, %arg7: memref<1x256xf32, #tpu.memory_space<vmem>>, %arg8: memref<1x256xf32, #tpu.memory_space<vmem>>, %arg9: memref<16x256xf32, #tpu.memory_space<vmem>>, %arg10: memref<32x128xi32, #tpu.memory_space<vmem>>, %arg11: memref<2x!tpu.dma_semaphore, #tpu.memory_space<semaphore_mem>>) attributes {dimension_semantics = [#tpu.dimension_semantics<arbitrary>, #tpu.dimension_semantics<arbitrary>], iteration_bounds = array<i64: 1, 2>, scalar_prefetch = 1 : i64, scratch_operands = 2 : i64, tpu.core_type = #tpu.core_type<tc>, window_params = [{}, {transform_indices = @transform_1, window_bounds = array<i64: 16, 128>}, {pipeline_mode = #tpu.pipeline_mode<synchronous>, transform_indices = @transform_2, window_bounds = array<i64: 2, 256>}, {transform_indices = @transform_3, window_bounds = array<i64: 16, 1>}, {pipeline_mode = #tpu.pipeline_mode<synchronous>, transform_indices = @transform_4, window_bounds = array<i64: 1, 256>}, {pipeline_mode = #tpu.pipeline_mode<synchronous>, transform_indices = @transform_5, window_bounds = array<i64: 1, 256>}, {transform_indices = @transform_6, window_bounds = array<i64: 16, 256>}]} {
    %c2_i32 = arith.constant 2 : i32
    %0 = arith.muli %arg0, %c2_i32 : i32
    %1 = arith.addi %0, %arg1 : i32
    %c1_i32 = arith.constant 1 : i32
    %2 = arith.andi %1, %c1_i32 : i32
    %c0_i32 = arith.constant 0 : i32
    %3 = arith.cmpi eq, %1, %c0_i32 : i32
    %4 = arith.extui %3 : i1 to i32
    %c0_i32_0 = arith.constant 0 : i32
    %5 = arith.cmpi ne, %4, %c0_i32_0 : i32
    scf.if %5 {
      %c1_i32_26 = arith.constant 1 : i32
      %70 = arith.muli %arg1, %c1_i32_26 : i32
      %71 = arith.addi %70, %arg0 : i32
      %c16_i32_27 = arith.constant 16 : i32
      %72 = arith.muli %71, %c16_i32_27 : i32
      %c0_i32_28 = arith.constant 0 : i32
      %73 = arith.addi %72, %c0_i32_28 : i32
      %74 = arith.index_cast %73 : i32 to index
      %75 = memref.load %arg2[%74] : memref<32xi32, #tpu.memory_space<smem>>
      %c0_i32_29 = arith.constant 0 : i32
      %76 = arith.addi %c0_i32_29, %c0_i32_28 : i32
      %c0_i32_30 = arith.constant 0 : i32
      %c0_i32_31 = arith.constant 0 : i32
      %77 = tpu.memref_slice %arg3[%75, %c0_i32_31] : memref<512x128xi32, #tpu.memory_space<any>> -> memref<1x128xi32, #tpu.memory_space<any>>
      %c0_i32_32 = arith.constant 0 : i32
      %78 = tpu.memref_slice %arg10[%76, %c0_i32_32] : memref<32x128xi32, #tpu.memory_space<vmem>> -> memref<1x128xi32, #tpu.memory_space<vmem>>
      %79 = tpu.memref_slice %arg11[%c0_i32_30] : memref<2x!tpu.dma_semaphore, #tpu.memory_space<semaphore_mem>> -> memref<1x!tpu.dma_semaphore, #tpu.memory_space<semaphore_mem>>
      %80 = tpu.memref_squeeze %79 : memref<1x!tpu.dma_semaphore, #tpu.memory_space<semaphore_mem>> -> memref<!tpu.dma_semaphore, #tpu.memory_space<semaphore_mem>>
      tpu.enqueue_dma source(%77 : memref<1x128xi32, #tpu.memory_space<any>>) target(%78 : memref<1x128xi32, #tpu.memory_space<vmem>>) target_semaphore(%80 : memref<!tpu.dma_semaphore, #tpu.memory_space<semaphore_mem>>)
      %c1_i32_33 = arith.constant 1 : i32
      %81 = arith.addi %72, %c1_i32_33 : i32
      %82 = arith.index_cast %81 : i32 to index
      %83 = memref.load %arg2[%82] : memref<32xi32, #tpu.memory_space<smem>>
      %c0_i32_34 = arith.constant 0 : i32
      %84 = arith.addi %c0_i32_34, %c1_i32_33 : i32
      %c0_i32_35 = arith.constant 0 : i32
      %c0_i32_36 = arith.constant 0 : i32
      %85 = tpu.memref_slice %arg3[%83, %c0_i32_36] : memref<512x128xi32, #tpu.memory_space<any>> -> memref<1x128xi32, #tpu.memory_space<any>>
      %c0_i32_37 = arith.constant 0 : i32
      %86 = tpu.memref_slice %arg10[%84, %c0_i32_37] : memref<32x128xi32, #tpu.memory_space<vmem>> -> memref<1x128xi32, #tpu.memory_space<vmem>>
      %87 = tpu.memref_slice %arg11[%c0_i32_35] : memref<2x!tpu.dma_semaphore, #tpu.memory_space<semaphore_mem>> -> memref<1x!tpu.dma_semaphore, #tpu.memory_space<semaphore_mem>>
      %88 = tpu.memref_squeeze %87 : memref<1x!tpu.dma_semaphore, #tpu.memory_space<semaphore_mem>> -> memref<!tpu.dma_semaphore, #tpu.memory_space<semaphore_mem>>
      tpu.enqueue_dma source(%85 : memref<1x128xi32, #tpu.memory_space<any>>) target(%86 : memref<1x128xi32, #tpu.memory_space<vmem>>) target_semaphore(%88 : memref<!tpu.dma_semaphore, #tpu.memory_space<semaphore_mem>>)
      %c2_i32_38 = arith.constant 2 : i32
      %89 = arith.addi %72, %c2_i32_38 : i32
      %90 = arith.index_cast %89 : i32 to index
      %91 = memref.load %arg2[%90] : memref<32xi32, #tpu.memory_space<smem>>
      %c0_i32_39 = arith.constant 0 : i32
      %92 = arith.addi %c0_i32_39, %c2_i32_38 : i32
      %c0_i32_40 = arith.constant 0 : i32
      %c0_i32_41 = arith.constant 0 : i32
      %93 = tpu.memref_slice %arg3[%91, %c0_i32_41] : memref<512x128xi32, #tpu.memory_space<any>> -> memref<1x128xi32, #tpu.memory_space<any>>
      %c0_i32_42 = arith.constant 0 : i32
      %94 = tpu.memref_slice %arg10[%92, %c0_i32_42] : memref<32x128xi32, #tpu.memory_space<vmem>> -> memref<1x128xi32, #tpu.memory_space<vmem>>
      %95 = tpu.memref_slice %arg11[%c0_i32_40] : memref<2x!tpu.dma_semaphore, #tpu.memory_space<semaphore_mem>> -> memref<1x!tpu.dma_semaphore, #tpu.memory_space<semaphore_mem>>
      %96 = tpu.memref_squeeze %95 : memref<1x!tpu.dma_semaphore, #tpu.memory_space<semaphore_mem>> -> memref<!tpu.dma_semaphore, #tpu.memory_space<semaphore_mem>>
      tpu.enqueue_dma source(%93 : memref<1x128xi32, #tpu.memory_space<any>>) target(%94 : memref<1x128xi32, #tpu.memory_space<vmem>>) target_semaphore(%96 : memref<!tpu.dma_semaphore, #tpu.memory_space<semaphore_mem>>)
      %c3_i32 = arith.constant 3 : i32
      %97 = arith.addi %72, %c3_i32 : i32
      %98 = arith.index_cast %97 : i32 to index
      %99 = memref.load %arg2[%98] : memref<32xi32, #tpu.memory_space<smem>>
      %c0_i32_43 = arith.constant 0 : i32
      %100 = arith.addi %c0_i32_43, %c3_i32 : i32
      %c0_i32_44 = arith.constant 0 : i32
      %c0_i32_45 = arith.constant 0 : i32
      %101 = tpu.memref_slice %arg3[%99, %c0_i32_45] : memref<512x128xi32, #tpu.memory_space<any>> -> memref<1x128xi32, #tpu.memory_space<any>>
      %c0_i32_46 = arith.constant 0 : i32
      %102 = tpu.memref_slice %arg10[%100, %c0_i32_46] : memref<32x128xi32, #tpu.memory_space<vmem>> -> memref<1x128xi32, #tpu.memory_space<vmem>>
      %103 = tpu.memref_slice %arg11[%c0_i32_44] : memref<2x!tpu.dma_semaphore, #tpu.memory_space<semaphore_mem>> -> memref<1x!tpu.dma_semaphore, #tpu.memory_space<semaphore_mem>>
      %104 = tpu.memref_squeeze %103 : memref<1x!tpu.dma_semaphore, #tpu.memory_space<semaphore_mem>> -> memref<!tpu.dma_semaphore, #tpu.memory_space<semaphore_mem>>
      tpu.enqueue_dma source(%101 : memref<1x128xi32, #tpu.memory_space<any>>) target(%102 : memref<1x128xi32, #tpu.memory_space<vmem>>) target_semaphore(%104 : memref<!tpu.dma_semaphore, #tpu.memory_space<semaphore_mem>>)
      %c4_i32 = arith.constant 4 : i32
      %105 = arith.addi %72, %c4_i32 : i32
      %106 = arith.index_cast %105 : i32 to index
      %107 = memref.load %arg2[%106] : memref<32xi32, #tpu.memory_space<smem>>
      %c0_i32_47 = arith.constant 0 : i32
      %108 = arith.addi %c0_i32_47, %c4_i32 : i32
      %c0_i32_48 = arith.constant 0 : i32
      %c0_i32_49 = arith.constant 0 : i32
      %109 = tpu.memref_slice %arg3[%107, %c0_i32_49] : memref<512x128xi32, #tpu.memory_space<any>> -> memref<1x128xi32, #tpu.memory_space<any>>
      %c0_i32_50 = arith.constant 0 : i32
      %110 = tpu.memref_slice %arg10[%108, %c0_i32_50] : memref<32x128xi32, #tpu.memory_space<vmem>> -> memref<1x128xi32, #tpu.memory_space<vmem>>
      %111 = tpu.memref_slice %arg11[%c0_i32_48] : memref<2x!tpu.dma_semaphore, #tpu.memory_space<semaphore_mem>> -> memref<1x!tpu.dma_semaphore, #tpu.memory_space<semaphore_mem>>
      %112 = tpu.memref_squeeze %111 : memref<1x!tpu.dma_semaphore, #tpu.memory_space<semaphore_mem>> -> memref<!tpu.dma_semaphore, #tpu.memory_space<semaphore_mem>>
      tpu.enqueue_dma source(%109 : memref<1x128xi32, #tpu.memory_space<any>>) target(%110 : memref<1x128xi32, #tpu.memory_space<vmem>>) target_semaphore(%112 : memref<!tpu.dma_semaphore, #tpu.memory_space<semaphore_mem>>)
      %c5_i32 = arith.constant 5 : i32
      %113 = arith.addi %72, %c5_i32 : i32
      %114 = arith.index_cast %113 : i32 to index
      %115 = memref.load %arg2[%114] : memref<32xi32, #tpu.memory_space<smem>>
      %c0_i32_51 = arith.constant 0 : i32
      %116 = arith.addi %c0_i32_51, %c5_i32 : i32
      %c0_i32_52 = arith.constant 0 : i32
      %c0_i32_53 = arith.constant 0 : i32
      %117 = tpu.memref_slice %arg3[%115, %c0_i32_53] : memref<512x128xi32, #tpu.memory_space<any>> -> memref<1x128xi32, #tpu.memory_space<any>>
      %c0_i32_54 = arith.constant 0 : i32
      %118 = tpu.memref_slice %arg10[%116, %c0_i32_54] : memref<32x128xi32, #tpu.memory_space<vmem>> -> memref<1x128xi32, #tpu.memory_space<vmem>>
      %119 = tpu.memref_slice %arg11[%c0_i32_52] : memref<2x!tpu.dma_semaphore, #tpu.memory_space<semaphore_mem>> -> memref<1x!tpu.dma_semaphore, #tpu.memory_space<semaphore_mem>>
      %120 = tpu.memref_squeeze %119 : memref<1x!tpu.dma_semaphore, #tpu.memory_space<semaphore_mem>> -> memref<!tpu.dma_semaphore, #tpu.memory_space<semaphore_mem>>
      tpu.enqueue_dma source(%117 : memref<1x128xi32, #tpu.memory_space<any>>) target(%118 : memref<1x128xi32, #tpu.memory_space<vmem>>) target_semaphore(%120 : memref<!tpu.dma_semaphore, #tpu.memory_space<semaphore_mem>>)
      %c6_i32 = arith.constant 6 : i32
      %121 = arith.addi %72, %c6_i32 : i32
      %122 = arith.index_cast %121 : i32 to index
      %123 = memref.load %arg2[%122] : memref<32xi32, #tpu.memory_space<smem>>
      %c0_i32_55 = arith.constant 0 : i32
      %124 = arith.addi %c0_i32_55, %c6_i32 : i32
      %c0_i32_56 = arith.constant 0 : i32
      %c0_i32_57 = arith.constant 0 : i32
      %125 = tpu.memref_slice %arg3[%123, %c0_i32_57] : memref<512x128xi32, #tpu.memory_space<any>> -> memref<1x128xi32, #tpu.memory_space<any>>
      %c0_i32_58 = arith.constant 0 : i32
      %126 = tpu.memref_slice %arg10[%124, %c0_i32_58] : memref<32x128xi32, #tpu.memory_space<vmem>> -> memref<1x128xi32, #tpu.memory_space<vmem>>
      %127 = tpu.memref_slice %arg11[%c0_i32_56] : memref<2x!tpu.dma_semaphore, #tpu.memory_space<semaphore_mem>> -> memref<1x!tpu.dma_semaphore, #tpu.memory_space<semaphore_mem>>
      %128 = tpu.memref_squeeze %127 : memref<1x!tpu.dma_semaphore, #tpu.memory_space<semaphore_mem>> -> memref<!tpu.dma_semaphore, #tpu.memory_space<semaphore_mem>>
      tpu.enqueue_dma source(%125 : memref<1x128xi32, #tpu.memory_space<any>>) target(%126 : memref<1x128xi32, #tpu.memory_space<vmem>>) target_semaphore(%128 : memref<!tpu.dma_semaphore, #tpu.memory_space<semaphore_mem>>)
      %c7_i32 = arith.constant 7 : i32
      %129 = arith.addi %72, %c7_i32 : i32
      %130 = arith.index_cast %129 : i32 to index
      %131 = memref.load %arg2[%130] : memref<32xi32, #tpu.memory_space<smem>>
      %c0_i32_59 = arith.constant 0 : i32
      %132 = arith.addi %c0_i32_59, %c7_i32 : i32
      %c0_i32_60 = arith.constant 0 : i32
      %c0_i32_61 = arith.constant 0 : i32
      %133 = tpu.memref_slice %arg3[%131, %c0_i32_61] : memref<512x128xi32, #tpu.memory_space<any>> -> memref<1x128xi32, #tpu.memory_space<any>>
      %c0_i32_62 = arith.constant 0 : i32
      %134 = tpu.memref_slice %arg10[%132, %c0_i32_62] : memref<32x128xi32, #tpu.memory_space<vmem>> -> memref<1x128xi32, #tpu.memory_space<vmem>>
      %135 = tpu.memref_slice %arg11[%c0_i32_60] : memref<2x!tpu.dma_semaphore, #tpu.memory_space<semaphore_mem>> -> memref<1x!tpu.dma_semaphore, #tpu.memory_space<semaphore_mem>>
      %136 = tpu.memref_squeeze %135 : memref<1x!tpu.dma_semaphore, #tpu.memory_space<semaphore_mem>> -> memref<!tpu.dma_semaphore, #tpu.memory_space<semaphore_mem>>
      tpu.enqueue_dma source(%133 : memref<1x128xi32, #tpu.memory_space<any>>) target(%134 : memref<1x128xi32, #tpu.memory_space<vmem>>) target_semaphore(%136 : memref<!tpu.dma_semaphore, #tpu.memory_space<semaphore_mem>>)
      %c8_i32 = arith.constant 8 : i32
      %137 = arith.addi %72, %c8_i32 : i32
      %138 = arith.index_cast %137 : i32 to index
      %139 = memref.load %arg2[%138] : memref<32xi32, #tpu.memory_space<smem>>
      %c0_i32_63 = arith.constant 0 : i32
      %140 = arith.addi %c0_i32_63, %c8_i32 : i32
      %c0_i32_64 = arith.constant 0 : i32
      %c0_i32_65 = arith.constant 0 : i32
      %141 = tpu.memref_slice %arg3[%139, %c0_i32_65] : memref<512x128xi32, #tpu.memory_space<any>> -> memref<1x128xi32, #tpu.memory_space<any>>
      %c0_i32_66 = arith.constant 0 : i32
      %142 = tpu.memref_slice %arg10[%140, %c0_i32_66] : memref<32x128xi32, #tpu.memory_space<vmem>> -> memref<1x128xi32, #tpu.memory_space<vmem>>
      %143 = tpu.memref_slice %arg11[%c0_i32_64] : memref<2x!tpu.dma_semaphore, #tpu.memory_space<semaphore_mem>> -> memref<1x!tpu.dma_semaphore, #tpu.memory_space<semaphore_mem>>
      %144 = tpu.memref_squeeze %143 : memref<1x!tpu.dma_semaphore, #tpu.memory_space<semaphore_mem>> -> memref<!tpu.dma_semaphore, #tpu.memory_space<semaphore_mem>>
      tpu.enqueue_dma source(%141 : memref<1x128xi32, #tpu.memory_space<any>>) target(%142 : memref<1x128xi32, #tpu.memory_space<vmem>>) target_semaphore(%144 : memref<!tpu.dma_semaphore, #tpu.memory_space<semaphore_mem>>)
      %c9_i32 = arith.constant 9 : i32
      %145 = arith.addi %72, %c9_i32 : i32
      %146 = arith.index_cast %145 : i32 to index
      %147 = memref.load %arg2[%146] : memref<32xi32, #tpu.memory_space<smem>>
      %c0_i32_67 = arith.constant 0 : i32
      %148 = arith.addi %c0_i32_67, %c9_i32 : i32
      %c0_i32_68 = arith.constant 0 : i32
      %c0_i32_69 = arith.constant 0 : i32
      %149 = tpu.memref_slice %arg3[%147, %c0_i32_69] : memref<512x128xi32, #tpu.memory_space<any>> -> memref<1x128xi32, #tpu.memory_space<any>>
      %c0_i32_70 = arith.constant 0 : i32
      %150 = tpu.memref_slice %arg10[%148, %c0_i32_70] : memref<32x128xi32, #tpu.memory_space<vmem>> -> memref<1x128xi32, #tpu.memory_space<vmem>>
      %151 = tpu.memref_slice %arg11[%c0_i32_68] : memref<2x!tpu.dma_semaphore, #tpu.memory_space<semaphore_mem>> -> memref<1x!tpu.dma_semaphore, #tpu.memory_space<semaphore_mem>>
      %152 = tpu.memref_squeeze %151 : memref<1x!tpu.dma_semaphore, #tpu.memory_space<semaphore_mem>> -> memref<!tpu.dma_semaphore, #tpu.memory_space<semaphore_mem>>
      tpu.enqueue_dma source(%149 : memref<1x128xi32, #tpu.memory_space<any>>) target(%150 : memref<1x128xi32, #tpu.memory_space<vmem>>) target_semaphore(%152 : memref<!tpu.dma_semaphore, #tpu.memory_space<semaphore_mem>>)
      %c10_i32 = arith.constant 10 : i32
      %153 = arith.addi %72, %c10_i32 : i32
      %154 = arith.index_cast %153 : i32 to index
      %155 = memref.load %arg2[%154] : memref<32xi32, #tpu.memory_space<smem>>
      %c0_i32_71 = arith.constant 0 : i32
      %156 = arith.addi %c0_i32_71, %c10_i32 : i32
      %c0_i32_72 = arith.constant 0 : i32
      %c0_i32_73 = arith.constant 0 : i32
      %157 = tpu.memref_slice %arg3[%155, %c0_i32_73] : memref<512x128xi32, #tpu.memory_space<any>> -> memref<1x128xi32, #tpu.memory_space<any>>
      %c0_i32_74 = arith.constant 0 : i32
      %158 = tpu.memref_slice %arg10[%156, %c0_i32_74] : memref<32x128xi32, #tpu.memory_space<vmem>> -> memref<1x128xi32, #tpu.memory_space<vmem>>
      %159 = tpu.memref_slice %arg11[%c0_i32_72] : memref<2x!tpu.dma_semaphore, #tpu.memory_space<semaphore_mem>> -> memref<1x!tpu.dma_semaphore, #tpu.memory_space<semaphore_mem>>
      %160 = tpu.memref_squeeze %159 : memref<1x!tpu.dma_semaphore, #tpu.memory_space<semaphore_mem>> -> memref<!tpu.dma_semaphore, #tpu.memory_space<semaphore_mem>>
      tpu.enqueue_dma source(%157 : memref<1x128xi32, #tpu.memory_space<any>>) target(%158 : memref<1x128xi32, #tpu.memory_space<vmem>>) target_semaphore(%160 : memref<!tpu.dma_semaphore, #tpu.memory_space<semaphore_mem>>)
      %c11_i32 = arith.constant 11 : i32
      %161 = arith.addi %72, %c11_i32 : i32
      %162 = arith.index_cast %161 : i32 to index
      %163 = memref.load %arg2[%162] : memref<32xi32, #tpu.memory_space<smem>>
      %c0_i32_75 = arith.constant 0 : i32
      %164 = arith.addi %c0_i32_75, %c11_i32 : i32
      %c0_i32_76 = arith.constant 0 : i32
      %c0_i32_77 = arith.constant 0 : i32
      %165 = tpu.memref_slice %arg3[%163, %c0_i32_77] : memref<512x128xi32, #tpu.memory_space<any>> -> memref<1x128xi32, #tpu.memory_space<any>>
      %c0_i32_78 = arith.constant 0 : i32
      %166 = tpu.memref_slice %arg10[%164, %c0_i32_78] : memref<32x128xi32, #tpu.memory_space<vmem>> -> memref<1x128xi32, #tpu.memory_space<vmem>>
      %167 = tpu.memref_slice %arg11[%c0_i32_76] : memref<2x!tpu.dma_semaphore, #tpu.memory_space<semaphore_mem>> -> memref<1x!tpu.dma_semaphore, #tpu.memory_space<semaphore_mem>>
      %168 = tpu.memref_squeeze %167 : memref<1x!tpu.dma_semaphore, #tpu.memory_space<semaphore_mem>> -> memref<!tpu.dma_semaphore, #tpu.memory_space<semaphore_mem>>
      tpu.enqueue_dma source(%165 : memref<1x128xi32, #tpu.memory_space<any>>) target(%166 : memref<1x128xi32, #tpu.memory_space<vmem>>) target_semaphore(%168 : memref<!tpu.dma_semaphore, #tpu.memory_space<semaphore_mem>>)
      %c12_i32 = arith.constant 12 : i32
      %169 = arith.addi %72, %c12_i32 : i32
      %170 = arith.index_cast %169 : i32 to index
      %171 = memref.load %arg2[%170] : memref<32xi32, #tpu.memory_space<smem>>
      %c0_i32_79 = arith.constant 0 : i32
      %172 = arith.addi %c0_i32_79, %c12_i32 : i32
      %c0_i32_80 = arith.constant 0 : i32
      %c0_i32_81 = arith.constant 0 : i32
      %173 = tpu.memref_slice %arg3[%171, %c0_i32_81] : memref<512x128xi32, #tpu.memory_space<any>> -> memref<1x128xi32, #tpu.memory_space<any>>
      %c0_i32_82 = arith.constant 0 : i32
      %174 = tpu.memref_slice %arg10[%172, %c0_i32_82] : memref<32x128xi32, #tpu.memory_space<vmem>> -> memref<1x128xi32, #tpu.memory_space<vmem>>
      %175 = tpu.memref_slice %arg11[%c0_i32_80] : memref<2x!tpu.dma_semaphore, #tpu.memory_space<semaphore_mem>> -> memref<1x!tpu.dma_semaphore, #tpu.memory_space<semaphore_mem>>
      %176 = tpu.memref_squeeze %175 : memref<1x!tpu.dma_semaphore, #tpu.memory_space<semaphore_mem>> -> memref<!tpu.dma_semaphore, #tpu.memory_space<semaphore_mem>>
      tpu.enqueue_dma source(%173 : memref<1x128xi32, #tpu.memory_space<any>>) target(%174 : memref<1x128xi32, #tpu.memory_space<vmem>>) target_semaphore(%176 : memref<!tpu.dma_semaphore, #tpu.memory_space<semaphore_mem>>)
      %c13_i32 = arith.constant 13 : i32
      %177 = arith.addi %72, %c13_i32 : i32
      %178 = arith.index_cast %177 : i32 to index
      %179 = memref.load %arg2[%178] : memref<32xi32, #tpu.memory_space<smem>>
      %c0_i32_83 = arith.constant 0 : i32
      %180 = arith.addi %c0_i32_83, %c13_i32 : i32
      %c0_i32_84 = arith.constant 0 : i32
      %c0_i32_85 = arith.constant 0 : i32
      %181 = tpu.memref_slice %arg3[%179, %c0_i32_85] : memref<512x128xi32, #tpu.memory_space<any>> -> memref<1x128xi32, #tpu.memory_space<any>>
      %c0_i32_86 = arith.constant 0 : i32
      %182 = tpu.memref_slice %arg10[%180, %c0_i32_86] : memref<32x128xi32, #tpu.memory_space<vmem>> -> memref<1x128xi32, #tpu.memory_space<vmem>>
      %183 = tpu.memref_slice %arg11[%c0_i32_84] : memref<2x!tpu.dma_semaphore, #tpu.memory_space<semaphore_mem>> -> memref<1x!tpu.dma_semaphore, #tpu.memory_space<semaphore_mem>>
      %184 = tpu.memref_squeeze %183 : memref<1x!tpu.dma_semaphore, #tpu.memory_space<semaphore_mem>> -> memref<!tpu.dma_semaphore, #tpu.memory_space<semaphore_mem>>
      tpu.enqueue_dma source(%181 : memref<1x128xi32, #tpu.memory_space<any>>) target(%182 : memref<1x128xi32, #tpu.memory_space<vmem>>) target_semaphore(%184 : memref<!tpu.dma_semaphore, #tpu.memory_space<semaphore_mem>>)
      %c14_i32 = arith.constant 14 : i32
      %185 = arith.addi %72, %c14_i32 : i32
      %186 = arith.index_cast %185 : i32 to index
      %187 = memref.load %arg2[%186] : memref<32xi32, #tpu.memory_space<smem>>
      %c0_i32_87 = arith.constant 0 : i32
      %188 = arith.addi %c0_i32_87, %c14_i32 : i32
      %c0_i32_88 = arith.constant 0 : i32
      %c0_i32_89 = arith.constant 0 : i32
      %189 = tpu.memref_slice %arg3[%187, %c0_i32_89] : memref<512x128xi32, #tpu.memory_space<any>> -> memref<1x128xi32, #tpu.memory_space<any>>
      %c0_i32_90 = arith.constant 0 : i32
      %190 = tpu.memref_slice %arg10[%188, %c0_i32_90] : memref<32x128xi32, #tpu.memory_space<vmem>> -> memref<1x128xi32, #tpu.memory_space<vmem>>
      %191 = tpu.memref_slice %arg11[%c0_i32_88] : memref<2x!tpu.dma_semaphore, #tpu.memory_space<semaphore_mem>> -> memref<1x!tpu.dma_semaphore, #tpu.memory_space<semaphore_mem>>
      %192 = tpu.memref_squeeze %191 : memref<1x!tpu.dma_semaphore, #tpu.memory_space<semaphore_mem>> -> memref<!tpu.dma_semaphore, #tpu.memory_space<semaphore_mem>>
      tpu.enqueue_dma source(%189 : memref<1x128xi32, #tpu.memory_space<any>>) target(%190 : memref<1x128xi32, #tpu.memory_space<vmem>>) target_semaphore(%192 : memref<!tpu.dma_semaphore, #tpu.memory_space<semaphore_mem>>)
      %c15_i32 = arith.constant 15 : i32
      %193 = arith.addi %72, %c15_i32 : i32
      %194 = arith.index_cast %193 : i32 to index
      %195 = memref.load %arg2[%194] : memref<32xi32, #tpu.memory_space<smem>>
      %c0_i32_91 = arith.constant 0 : i32
      %196 = arith.addi %c0_i32_91, %c15_i32 : i32
      %c0_i32_92 = arith.constant 0 : i32
      %c0_i32_93 = arith.constant 0 : i32
      %197 = tpu.memref_slice %arg3[%195, %c0_i32_93] : memref<512x128xi32, #tpu.memory_space<any>> -> memref<1x128xi32, #tpu.memory_space<any>>
      %c0_i32_94 = arith.constant 0 : i32
      %198 = tpu.memref_slice %arg10[%196, %c0_i32_94] : memref<32x128xi32, #tpu.memory_space<vmem>> -> memref<1x128xi32, #tpu.memory_space<vmem>>
      %199 = tpu.memref_slice %arg11[%c0_i32_92] : memref<2x!tpu.dma_semaphore, #tpu.memory_space<semaphore_mem>> -> memref<1x!tpu.dma_semaphore, #tpu.memory_space<semaphore_mem>>
      %200 = tpu.memref_squeeze %199 : memref<1x!tpu.dma_semaphore, #tpu.memory_space<semaphore_mem>> -> memref<!tpu.dma_semaphore, #tpu.memory_space<semaphore_mem>>
      tpu.enqueue_dma source(%197 : memref<1x128xi32, #tpu.memory_space<any>>) target(%198 : memref<1x128xi32, #tpu.memory_space<vmem>>) target_semaphore(%200 : memref<!tpu.dma_semaphore, #tpu.memory_space<semaphore_mem>>)
      %c16_i32_95 = arith.constant 16 : i32
    } else {
    }
    %c1_i32_1 = arith.constant 1 : i32
    %6 = arith.addi %1, %c1_i32_1 : i32
    %c2_i32_2 = arith.constant 2 : i32
    %7 = arith.cmpi slt, %6, %c2_i32_2 : i32
    %8 = arith.extui %7 : i1 to i32
    %c0_i32_3 = arith.constant 0 : i32
    %9 = arith.cmpi ne, %8, %c0_i32_3 : i32
    scf.if %9 {
      %c1_i32_26 = arith.constant 1 : i32
      %70 = arith.addi %arg1, %c1_i32_26 : i32
      %c2_i32_27 = arith.constant 2 : i32
      %71 = arith.cmpi eq, %70, %c2_i32_27 : i32
      %c1_i32_28 = arith.constant 1 : i32
      %72 = arith.addi %arg1, %c1_i32_28 : i32
      %c0_i32_29 = arith.constant 0 : i32
      %73 = arith.select %71, %c0_i32_29, %72 : i32
      %c1_i32_30 = arith.constant 1 : i32
      %74 = arith.addi %arg0, %c1_i32_30 : i32
      %75 = arith.select %71, %74, %arg0 : i32
      %c1_i32_31 = arith.constant 1 : i32
      %76 = arith.muli %73, %c1_i32_31 : i32
      %77 = arith.addi %76, %75 : i32
      %c1_i32_32 = arith.constant 1 : i32
      %78 = arith.subi %c1_i32_32, %2 : i32
      %c16_i32_33 = arith.constant 16 : i32
      %79 = arith.muli %77, %c16_i32_33 : i32
      %c16_i32_34 = arith.constant 16 : i32
      %80 = arith.muli %78, %c16_i32_34 : i32
      %c0_i32_35 = arith.constant 0 : i32
      %81 = arith.addi %79, %c0_i32_35 : i32
      %82 = arith.index_cast %81 : i32 to index
      %83 = memref.load %arg2[%82] : memref<32xi32, #tpu.memory_space<smem>>
      %84 = arith.addi %80, %c0_i32_35 : i32
      %c0_i32_36 = arith.constant 0 : i32
      %85 = tpu.memref_slice %arg3[%83, %c0_i32_36] : memref<512x128xi32, #tpu.memory_space<any>> -> memref<1x128xi32, #tpu.memory_space<any>>
      %c0_i32_37 = arith.constant 0 : i32
      %86 = tpu.memref_slice %arg10[%84, %c0_i32_37] : memref<32x128xi32, #tpu.memory_space<vmem>> -> memref<1x128xi32, #tpu.memory_space<vmem>>
      %87 = tpu.memref_slice %arg11[%78] : memref<2x!tpu.dma_semaphore, #tpu.memory_space<semaphore_mem>> -> memref<1x!tpu.dma_semaphore, #tpu.memory_space<semaphore_mem>>
      %88 = tpu.memref_squeeze %87 : memref<1x!tpu.dma_semaphore, #tpu.memory_space<semaphore_mem>> -> memref<!tpu.dma_semaphore, #tpu.memory_space<semaphore_mem>>
      tpu.enqueue_dma source(%85 : memref<1x128xi32, #tpu.memory_space<any>>) target(%86 : memref<1x128xi32, #tpu.memory_space<vmem>>) target_semaphore(%88 : memref<!tpu.dma_semaphore, #tpu.memory_space<semaphore_mem>>)
      %c1_i32_38 = arith.constant 1 : i32
      %89 = arith.addi %79, %c1_i32_38 : i32
      %90 = arith.index_cast %89 : i32 to index
      %91 = memref.load %arg2[%90] : memref<32xi32, #tpu.memory_space<smem>>
      %92 = arith.addi %80, %c1_i32_38 : i32
      %c0_i32_39 = arith.constant 0 : i32
      %93 = tpu.memref_slice %arg3[%91, %c0_i32_39] : memref<512x128xi32, #tpu.memory_space<any>> -> memref<1x128xi32, #tpu.memory_space<any>>
      %c0_i32_40 = arith.constant 0 : i32
      %94 = tpu.memref_slice %arg10[%92, %c0_i32_40] : memref<32x128xi32, #tpu.memory_space<vmem>> -> memref<1x128xi32, #tpu.memory_space<vmem>>
      %95 = tpu.memref_slice %arg11[%78] : memref<2x!tpu.dma_semaphore, #tpu.memory_space<semaphore_mem>> -> memref<1x!tpu.dma_semaphore, #tpu.memory_space<semaphore_mem>>
      %96 = tpu.memref_squeeze %95 : memref<1x!tpu.dma_semaphore, #tpu.memory_space<semaphore_mem>> -> memref<!tpu.dma_semaphore, #tpu.memory_space<semaphore_mem>>
      tpu.enqueue_dma source(%93 : memref<1x128xi32, #tpu.memory_space<any>>) target(%94 : memref<1x128xi32, #tpu.memory_space<vmem>>) target_semaphore(%96 : memref<!tpu.dma_semaphore, #tpu.memory_space<semaphore_mem>>)
      %c2_i32_41 = arith.constant 2 : i32
      %97 = arith.addi %79, %c2_i32_41 : i32
      %98 = arith.index_cast %97 : i32 to index
      %99 = memref.load %arg2[%98] : memref<32xi32, #tpu.memory_space<smem>>
      %100 = arith.addi %80, %c2_i32_41 : i32
      %c0_i32_42 = arith.constant 0 : i32
      %101 = tpu.memref_slice %arg3[%99, %c0_i32_42] : memref<512x128xi32, #tpu.memory_space<any>> -> memref<1x128xi32, #tpu.memory_space<any>>
      %c0_i32_43 = arith.constant 0 : i32
      %102 = tpu.memref_slice %arg10[%100, %c0_i32_43] : memref<32x128xi32, #tpu.memory_space<vmem>> -> memref<1x128xi32, #tpu.memory_space<vmem>>
      %103 = tpu.memref_slice %arg11[%78] : memref<2x!tpu.dma_semaphore, #tpu.memory_space<semaphore_mem>> -> memref<1x!tpu.dma_semaphore, #tpu.memory_space<semaphore_mem>>
      %104 = tpu.memref_squeeze %103 : memref<1x!tpu.dma_semaphore, #tpu.memory_space<semaphore_mem>> -> memref<!tpu.dma_semaphore, #tpu.memory_space<semaphore_mem>>
      tpu.enqueue_dma source(%101 : memref<1x128xi32, #tpu.memory_space<any>>) target(%102 : memref<1x128xi32, #tpu.memory_space<vmem>>) target_semaphore(%104 : memref<!tpu.dma_semaphore, #tpu.memory_space<semaphore_mem>>)
      %c3_i32 = arith.constant 3 : i32
      %105 = arith.addi %79, %c3_i32 : i32
      %106 = arith.index_cast %105 : i32 to index
      %107 = memref.load %arg2[%106] : memref<32xi32, #tpu.memory_space<smem>>
      %108 = arith.addi %80, %c3_i32 : i32
      %c0_i32_44 = arith.constant 0 : i32
      %109 = tpu.memref_slice %arg3[%107, %c0_i32_44] : memref<512x128xi32, #tpu.memory_space<any>> -> memref<1x128xi32, #tpu.memory_space<any>>
      %c0_i32_45 = arith.constant 0 : i32
      %110 = tpu.memref_slice %arg10[%108, %c0_i32_45] : memref<32x128xi32, #tpu.memory_space<vmem>> -> memref<1x128xi32, #tpu.memory_space<vmem>>
      %111 = tpu.memref_slice %arg11[%78] : memref<2x!tpu.dma_semaphore, #tpu.memory_space<semaphore_mem>> -> memref<1x!tpu.dma_semaphore, #tpu.memory_space<semaphore_mem>>
      %112 = tpu.memref_squeeze %111 : memref<1x!tpu.dma_semaphore, #tpu.memory_space<semaphore_mem>> -> memref<!tpu.dma_semaphore, #tpu.memory_space<semaphore_mem>>
      tpu.enqueue_dma source(%109 : memref<1x128xi32, #tpu.memory_space<any>>) target(%110 : memref<1x128xi32, #tpu.memory_space<vmem>>) target_semaphore(%112 : memref<!tpu.dma_semaphore, #tpu.memory_space<semaphore_mem>>)
      %c4_i32 = arith.constant 4 : i32
      %113 = arith.addi %79, %c4_i32 : i32
      %114 = arith.index_cast %113 : i32 to index
      %115 = memref.load %arg2[%114] : memref<32xi32, #tpu.memory_space<smem>>
      %116 = arith.addi %80, %c4_i32 : i32
      %c0_i32_46 = arith.constant 0 : i32
      %117 = tpu.memref_slice %arg3[%115, %c0_i32_46] : memref<512x128xi32, #tpu.memory_space<any>> -> memref<1x128xi32, #tpu.memory_space<any>>
      %c0_i32_47 = arith.constant 0 : i32
      %118 = tpu.memref_slice %arg10[%116, %c0_i32_47] : memref<32x128xi32, #tpu.memory_space<vmem>> -> memref<1x128xi32, #tpu.memory_space<vmem>>
      %119 = tpu.memref_slice %arg11[%78] : memref<2x!tpu.dma_semaphore, #tpu.memory_space<semaphore_mem>> -> memref<1x!tpu.dma_semaphore, #tpu.memory_space<semaphore_mem>>
      %120 = tpu.memref_squeeze %119 : memref<1x!tpu.dma_semaphore, #tpu.memory_space<semaphore_mem>> -> memref<!tpu.dma_semaphore, #tpu.memory_space<semaphore_mem>>
      tpu.enqueue_dma source(%117 : memref<1x128xi32, #tpu.memory_space<any>>) target(%118 : memref<1x128xi32, #tpu.memory_space<vmem>>) target_semaphore(%120 : memref<!tpu.dma_semaphore, #tpu.memory_space<semaphore_mem>>)
      %c5_i32 = arith.constant 5 : i32
      %121 = arith.addi %79, %c5_i32 : i32
      %122 = arith.index_cast %121 : i32 to index
      %123 = memref.load %arg2[%122] : memref<32xi32, #tpu.memory_space<smem>>
      %124 = arith.addi %80, %c5_i32 : i32
      %c0_i32_48 = arith.constant 0 : i32
      %125 = tpu.memref_slice %arg3[%123, %c0_i32_48] : memref<512x128xi32, #tpu.memory_space<any>> -> memref<1x128xi32, #tpu.memory_space<any>>
      %c0_i32_49 = arith.constant 0 : i32
      %126 = tpu.memref_slice %arg10[%124, %c0_i32_49] : memref<32x128xi32, #tpu.memory_space<vmem>> -> memref<1x128xi32, #tpu.memory_space<vmem>>
      %127 = tpu.memref_slice %arg11[%78] : memref<2x!tpu.dma_semaphore, #tpu.memory_space<semaphore_mem>> -> memref<1x!tpu.dma_semaphore, #tpu.memory_space<semaphore_mem>>
      %128 = tpu.memref_squeeze %127 : memref<1x!tpu.dma_semaphore, #tpu.memory_space<semaphore_mem>> -> memref<!tpu.dma_semaphore, #tpu.memory_space<semaphore_mem>>
      tpu.enqueue_dma source(%125 : memref<1x128xi32, #tpu.memory_space<any>>) target(%126 : memref<1x128xi32, #tpu.memory_space<vmem>>) target_semaphore(%128 : memref<!tpu.dma_semaphore, #tpu.memory_space<semaphore_mem>>)
      %c6_i32 = arith.constant 6 : i32
      %129 = arith.addi %79, %c6_i32 : i32
      %130 = arith.index_cast %129 : i32 to index
      %131 = memref.load %arg2[%130] : memref<32xi32, #tpu.memory_space<smem>>
      %132 = arith.addi %80, %c6_i32 : i32
      %c0_i32_50 = arith.constant 0 : i32
      %133 = tpu.memref_slice %arg3[%131, %c0_i32_50] : memref<512x128xi32, #tpu.memory_space<any>> -> memref<1x128xi32, #tpu.memory_space<any>>
      %c0_i32_51 = arith.constant 0 : i32
      %134 = tpu.memref_slice %arg10[%132, %c0_i32_51] : memref<32x128xi32, #tpu.memory_space<vmem>> -> memref<1x128xi32, #tpu.memory_space<vmem>>
      %135 = tpu.memref_slice %arg11[%78] : memref<2x!tpu.dma_semaphore, #tpu.memory_space<semaphore_mem>> -> memref<1x!tpu.dma_semaphore, #tpu.memory_space<semaphore_mem>>
      %136 = tpu.memref_squeeze %135 : memref<1x!tpu.dma_semaphore, #tpu.memory_space<semaphore_mem>> -> memref<!tpu.dma_semaphore, #tpu.memory_space<semaphore_mem>>
      tpu.enqueue_dma source(%133 : memref<1x128xi32, #tpu.memory_space<any>>) target(%134 : memref<1x128xi32, #tpu.memory_space<vmem>>) target_semaphore(%136 : memref<!tpu.dma_semaphore, #tpu.memory_space<semaphore_mem>>)
      %c7_i32 = arith.constant 7 : i32
      %137 = arith.addi %79, %c7_i32 : i32
      %138 = arith.index_cast %137 : i32 to index
      %139 = memref.load %arg2[%138] : memref<32xi32, #tpu.memory_space<smem>>
      %140 = arith.addi %80, %c7_i32 : i32
      %c0_i32_52 = arith.constant 0 : i32
      %141 = tpu.memref_slice %arg3[%139, %c0_i32_52] : memref<512x128xi32, #tpu.memory_space<any>> -> memref<1x128xi32, #tpu.memory_space<any>>
      %c0_i32_53 = arith.constant 0 : i32
      %142 = tpu.memref_slice %arg10[%140, %c0_i32_53] : memref<32x128xi32, #tpu.memory_space<vmem>> -> memref<1x128xi32, #tpu.memory_space<vmem>>
      %143 = tpu.memref_slice %arg11[%78] : memref<2x!tpu.dma_semaphore, #tpu.memory_space<semaphore_mem>> -> memref<1x!tpu.dma_semaphore, #tpu.memory_space<semaphore_mem>>
      %144 = tpu.memref_squeeze %143 : memref<1x!tpu.dma_semaphore, #tpu.memory_space<semaphore_mem>> -> memref<!tpu.dma_semaphore, #tpu.memory_space<semaphore_mem>>
      tpu.enqueue_dma source(%141 : memref<1x128xi32, #tpu.memory_space<any>>) target(%142 : memref<1x128xi32, #tpu.memory_space<vmem>>) target_semaphore(%144 : memref<!tpu.dma_semaphore, #tpu.memory_space<semaphore_mem>>)
      %c8_i32 = arith.constant 8 : i32
      %145 = arith.addi %79, %c8_i32 : i32
      %146 = arith.index_cast %145 : i32 to index
      %147 = memref.load %arg2[%146] : memref<32xi32, #tpu.memory_space<smem>>
      %148 = arith.addi %80, %c8_i32 : i32
      %c0_i32_54 = arith.constant 0 : i32
      %149 = tpu.memref_slice %arg3[%147, %c0_i32_54] : memref<512x128xi32, #tpu.memory_space<any>> -> memref<1x128xi32, #tpu.memory_space<any>>
      %c0_i32_55 = arith.constant 0 : i32
      %150 = tpu.memref_slice %arg10[%148, %c0_i32_55] : memref<32x128xi32, #tpu.memory_space<vmem>> -> memref<1x128xi32, #tpu.memory_space<vmem>>
      %151 = tpu.memref_slice %arg11[%78] : memref<2x!tpu.dma_semaphore, #tpu.memory_space<semaphore_mem>> -> memref<1x!tpu.dma_semaphore, #tpu.memory_space<semaphore_mem>>
      %152 = tpu.memref_squeeze %151 : memref<1x!tpu.dma_semaphore, #tpu.memory_space<semaphore_mem>> -> memref<!tpu.dma_semaphore, #tpu.memory_space<semaphore_mem>>
      tpu.enqueue_dma source(%149 : memref<1x128xi32, #tpu.memory_space<any>>) target(%150 : memref<1x128xi32, #tpu.memory_space<vmem>>) target_semaphore(%152 : memref<!tpu.dma_semaphore, #tpu.memory_space<semaphore_mem>>)
      %c9_i32 = arith.constant 9 : i32
      %153 = arith.addi %79, %c9_i32 : i32
      %154 = arith.index_cast %153 : i32 to index
      %155 = memref.load %arg2[%154] : memref<32xi32, #tpu.memory_space<smem>>
      %156 = arith.addi %80, %c9_i32 : i32
      %c0_i32_56 = arith.constant 0 : i32
      %157 = tpu.memref_slice %arg3[%155, %c0_i32_56] : memref<512x128xi32, #tpu.memory_space<any>> -> memref<1x128xi32, #tpu.memory_space<any>>
      %c0_i32_57 = arith.constant 0 : i32
      %158 = tpu.memref_slice %arg10[%156, %c0_i32_57] : memref<32x128xi32, #tpu.memory_space<vmem>> -> memref<1x128xi32, #tpu.memory_space<vmem>>
      %159 = tpu.memref_slice %arg11[%78] : memref<2x!tpu.dma_semaphore, #tpu.memory_space<semaphore_mem>> -> memref<1x!tpu.dma_semaphore, #tpu.memory_space<semaphore_mem>>
      %160 = tpu.memref_squeeze %159 : memref<1x!tpu.dma_semaphore, #tpu.memory_space<semaphore_mem>> -> memref<!tpu.dma_semaphore, #tpu.memory_space<semaphore_mem>>
      tpu.enqueue_dma source(%157 : memref<1x128xi32, #tpu.memory_space<any>>) target(%158 : memref<1x128xi32, #tpu.memory_space<vmem>>) target_semaphore(%160 : memref<!tpu.dma_semaphore, #tpu.memory_space<semaphore_mem>>)
      %c10_i32 = arith.constant 10 : i32
      %161 = arith.addi %79, %c10_i32 : i32
      %162 = arith.index_cast %161 : i32 to index
      %163 = memref.load %arg2[%162] : memref<32xi32, #tpu.memory_space<smem>>
      %164 = arith.addi %80, %c10_i32 : i32
      %c0_i32_58 = arith.constant 0 : i32
      %165 = tpu.memref_slice %arg3[%163, %c0_i32_58] : memref<512x128xi32, #tpu.memory_space<any>> -> memref<1x128xi32, #tpu.memory_space<any>>
      %c0_i32_59 = arith.constant 0 : i32
      %166 = tpu.memref_slice %arg10[%164, %c0_i32_59] : memref<32x128xi32, #tpu.memory_space<vmem>> -> memref<1x128xi32, #tpu.memory_space<vmem>>
      %167 = tpu.memref_slice %arg11[%78] : memref<2x!tpu.dma_semaphore, #tpu.memory_space<semaphore_mem>> -> memref<1x!tpu.dma_semaphore, #tpu.memory_space<semaphore_mem>>
      %168 = tpu.memref_squeeze %167 : memref<1x!tpu.dma_semaphore, #tpu.memory_space<semaphore_mem>> -> memref<!tpu.dma_semaphore, #tpu.memory_space<semaphore_mem>>
      tpu.enqueue_dma source(%165 : memref<1x128xi32, #tpu.memory_space<any>>) target(%166 : memref<1x128xi32, #tpu.memory_space<vmem>>) target_semaphore(%168 : memref<!tpu.dma_semaphore, #tpu.memory_space<semaphore_mem>>)
      %c11_i32 = arith.constant 11 : i32
      %169 = arith.addi %79, %c11_i32 : i32
      %170 = arith.index_cast %169 : i32 to index
      %171 = memref.load %arg2[%170] : memref<32xi32, #tpu.memory_space<smem>>
      %172 = arith.addi %80, %c11_i32 : i32
      %c0_i32_60 = arith.constant 0 : i32
      %173 = tpu.memref_slice %arg3[%171, %c0_i32_60] : memref<512x128xi32, #tpu.memory_space<any>> -> memref<1x128xi32, #tpu.memory_space<any>>
      %c0_i32_61 = arith.constant 0 : i32
      %174 = tpu.memref_slice %arg10[%172, %c0_i32_61] : memref<32x128xi32, #tpu.memory_space<vmem>> -> memref<1x128xi32, #tpu.memory_space<vmem>>
      %175 = tpu.memref_slice %arg11[%78] : memref<2x!tpu.dma_semaphore, #tpu.memory_space<semaphore_mem>> -> memref<1x!tpu.dma_semaphore, #tpu.memory_space<semaphore_mem>>
      %176 = tpu.memref_squeeze %175 : memref<1x!tpu.dma_semaphore, #tpu.memory_space<semaphore_mem>> -> memref<!tpu.dma_semaphore, #tpu.memory_space<semaphore_mem>>
      tpu.enqueue_dma source(%173 : memref<1x128xi32, #tpu.memory_space<any>>) target(%174 : memref<1x128xi32, #tpu.memory_space<vmem>>) target_semaphore(%176 : memref<!tpu.dma_semaphore, #tpu.memory_space<semaphore_mem>>)
      %c12_i32 = arith.constant 12 : i32
      %177 = arith.addi %79, %c12_i32 : i32
      %178 = arith.index_cast %177 : i32 to index
      %179 = memref.load %arg2[%178] : memref<32xi32, #tpu.memory_space<smem>>
      %180 = arith.addi %80, %c12_i32 : i32
      %c0_i32_62 = arith.constant 0 : i32
      %181 = tpu.memref_slice %arg3[%179, %c0_i32_62] : memref<512x128xi32, #tpu.memory_space<any>> -> memref<1x128xi32, #tpu.memory_space<any>>
      %c0_i32_63 = arith.constant 0 : i32
      %182 = tpu.memref_slice %arg10[%180, %c0_i32_63] : memref<32x128xi32, #tpu.memory_space<vmem>> -> memref<1x128xi32, #tpu.memory_space<vmem>>
      %183 = tpu.memref_slice %arg11[%78] : memref<2x!tpu.dma_semaphore, #tpu.memory_space<semaphore_mem>> -> memref<1x!tpu.dma_semaphore, #tpu.memory_space<semaphore_mem>>
      %184 = tpu.memref_squeeze %183 : memref<1x!tpu.dma_semaphore, #tpu.memory_space<semaphore_mem>> -> memref<!tpu.dma_semaphore, #tpu.memory_space<semaphore_mem>>
      tpu.enqueue_dma source(%181 : memref<1x128xi32, #tpu.memory_space<any>>) target(%182 : memref<1x128xi32, #tpu.memory_space<vmem>>) target_semaphore(%184 : memref<!tpu.dma_semaphore, #tpu.memory_space<semaphore_mem>>)
      %c13_i32 = arith.constant 13 : i32
      %185 = arith.addi %79, %c13_i32 : i32
      %186 = arith.index_cast %185 : i32 to index
      %187 = memref.load %arg2[%186] : memref<32xi32, #tpu.memory_space<smem>>
      %188 = arith.addi %80, %c13_i32 : i32
      %c0_i32_64 = arith.constant 0 : i32
      %189 = tpu.memref_slice %arg3[%187, %c0_i32_64] : memref<512x128xi32, #tpu.memory_space<any>> -> memref<1x128xi32, #tpu.memory_space<any>>
      %c0_i32_65 = arith.constant 0 : i32
      %190 = tpu.memref_slice %arg10[%188, %c0_i32_65] : memref<32x128xi32, #tpu.memory_space<vmem>> -> memref<1x128xi32, #tpu.memory_space<vmem>>
      %191 = tpu.memref_slice %arg11[%78] : memref<2x!tpu.dma_semaphore, #tpu.memory_space<semaphore_mem>> -> memref<1x!tpu.dma_semaphore, #tpu.memory_space<semaphore_mem>>
      %192 = tpu.memref_squeeze %191 : memref<1x!tpu.dma_semaphore, #tpu.memory_space<semaphore_mem>> -> memref<!tpu.dma_semaphore, #tpu.memory_space<semaphore_mem>>
      tpu.enqueue_dma source(%189 : memref<1x128xi32, #tpu.memory_space<any>>) target(%190 : memref<1x128xi32, #tpu.memory_space<vmem>>) target_semaphore(%192 : memref<!tpu.dma_semaphore, #tpu.memory_space<semaphore_mem>>)
      %c14_i32 = arith.constant 14 : i32
      %193 = arith.addi %79, %c14_i32 : i32
      %194 = arith.index_cast %193 : i32 to index
      %195 = memref.load %arg2[%194] : memref<32xi32, #tpu.memory_space<smem>>
      %196 = arith.addi %80, %c14_i32 : i32
      %c0_i32_66 = arith.constant 0 : i32
      %197 = tpu.memref_slice %arg3[%195, %c0_i32_66] : memref<512x128xi32, #tpu.memory_space<any>> -> memref<1x128xi32, #tpu.memory_space<any>>
      %c0_i32_67 = arith.constant 0 : i32
      %198 = tpu.memref_slice %arg10[%196, %c0_i32_67] : memref<32x128xi32, #tpu.memory_space<vmem>> -> memref<1x128xi32, #tpu.memory_space<vmem>>
      %199 = tpu.memref_slice %arg11[%78] : memref<2x!tpu.dma_semaphore, #tpu.memory_space<semaphore_mem>> -> memref<1x!tpu.dma_semaphore, #tpu.memory_space<semaphore_mem>>
      %200 = tpu.memref_squeeze %199 : memref<1x!tpu.dma_semaphore, #tpu.memory_space<semaphore_mem>> -> memref<!tpu.dma_semaphore, #tpu.memory_space<semaphore_mem>>
      tpu.enqueue_dma source(%197 : memref<1x128xi32, #tpu.memory_space<any>>) target(%198 : memref<1x128xi32, #tpu.memory_space<vmem>>) target_semaphore(%200 : memref<!tpu.dma_semaphore, #tpu.memory_space<semaphore_mem>>)
      %c15_i32 = arith.constant 15 : i32
      %201 = arith.addi %79, %c15_i32 : i32
      %202 = arith.index_cast %201 : i32 to index
      %203 = memref.load %arg2[%202] : memref<32xi32, #tpu.memory_space<smem>>
      %204 = arith.addi %80, %c15_i32 : i32
      %c0_i32_68 = arith.constant 0 : i32
      %205 = tpu.memref_slice %arg3[%203, %c0_i32_68] : memref<512x128xi32, #tpu.memory_space<any>> -> memref<1x128xi32, #tpu.memory_space<any>>
      %c0_i32_69 = arith.constant 0 : i32
      %206 = tpu.memref_slice %arg10[%204, %c0_i32_69] : memref<32x128xi32, #tpu.memory_space<vmem>> -> memref<1x128xi32, #tpu.memory_space<vmem>>
      %207 = tpu.memref_slice %arg11[%78] : memref<2x!tpu.dma_semaphore, #tpu.memory_space<semaphore_mem>> -> memref<1x!tpu.dma_semaphore, #tpu.memory_space<semaphore_mem>>
      %208 = tpu.memref_squeeze %207 : memref<1x!tpu.dma_semaphore, #tpu.memory_space<semaphore_mem>> -> memref<!tpu.dma_semaphore, #tpu.memory_space<semaphore_mem>>
      tpu.enqueue_dma source(%205 : memref<1x128xi32, #tpu.memory_space<any>>) target(%206 : memref<1x128xi32, #tpu.memory_space<vmem>>) target_semaphore(%208 : memref<!tpu.dma_semaphore, #tpu.memory_space<semaphore_mem>>)
      %c16_i32_70 = arith.constant 16 : i32
    } else {
    }
    %c16_i32 = arith.constant 16 : i32
    %10 = arith.muli %2, %c16_i32 : i32
    %11 = tpu.assume_multiple %10, 16 : i32
    %c0_i32_4 = arith.constant 0 : i32
    %c0_i32_5 = arith.constant 0 : i32
    %12 = tpu.memref_slice %arg3[%c0_i32_4, %c0_i32_5] : memref<512x128xi32, #tpu.memory_space<any>> -> memref<16x128xi32, #tpu.memory_space<any>>
    %c0_i32_6 = arith.constant 0 : i32
    %13 = tpu.memref_slice %arg10[%11, %c0_i32_6] : memref<32x128xi32, #tpu.memory_space<vmem>> -> memref<16x128xi32, #tpu.memory_space<vmem>>
    %14 = tpu.memref_slice %arg11[%2] : memref<2x!tpu.dma_semaphore, #tpu.memory_space<semaphore_mem>> -> memref<1x!tpu.dma_semaphore, #tpu.memory_space<semaphore_mem>>
    %15 = tpu.memref_squeeze %14 : memref<1x!tpu.dma_semaphore, #tpu.memory_space<semaphore_mem>> -> memref<!tpu.dma_semaphore, #tpu.memory_space<semaphore_mem>>
    tpu.wait_dma2 semaphore(%15 : memref<!tpu.dma_semaphore, #tpu.memory_space<semaphore_mem>>) src(%12 : memref<16x128xi32, #tpu.memory_space<any>>) dst(%13 : memref<16x128xi32, #tpu.memory_space<vmem>>)
    %16 = arith.index_cast %11 : i32 to index
    %c0 = arith.constant 0 : index
    %17 = vector.load %arg10[%16, %c0] : memref<32x128xi32, #tpu.memory_space<vmem>>, vector<16x128xi32>
    %c0_7 = arith.constant 0 : index
    %c0_8 = arith.constant 0 : index
    %18 = vector.load %arg4[%c0_7, %c0_8] : memref<16x128xi32, #tpu.memory_space<vmem>>, vector<16x128xi32>
    %c16_i32_9 = arith.constant 16 : i32
    %19 = vector.broadcast %c16_i32_9 : i32 to vector<16x128xi32>
    %20 = arith.shli %17, %19 : vector<16x128xi32>
    %21 = tpu.bitcast %20 : vector<16x128xi32> -> vector<16x128xf32>
    %c-65536_i32 = arith.constant -65536 : i32
    %22 = vector.broadcast %c-65536_i32 : i32 to vector<16x128xi32>
    %23 = arith.andi %17, %22 : vector<16x128xi32>
    %24 = tpu.bitcast %23 : vector<16x128xi32> -> vector<16x128xf32>
    %c16_i32_10 = arith.constant 16 : i32
    %25 = vector.broadcast %c16_i32_10 : i32 to vector<16x128xi32>
    %26 = arith.shli %18, %25 : vector<16x128xi32>
    %27 = tpu.bitcast %26 : vector<16x128xi32> -> vector<16x128xf32>
    %c-65536_i32_11 = arith.constant -65536 : i32
    %28 = vector.broadcast %c-65536_i32_11 : i32 to vector<16x128xi32>
    %29 = arith.andi %18, %28 : vector<16x128xi32>
    %30 = tpu.bitcast %29 : vector<16x128xi32> -> vector<16x128xf32>
    %31 = arith.addf %21, %27 : vector<16x128xf32>
    %32 = arith.addf %24, %30 : vector<16x128xf32>
    %33 = tpu.concatenate %31, %32 in 1 : vector<16x128xf32>, vector<16x128xf32> -> vector<16x256xf32>
    %c0_12 = arith.constant 0 : index
    %c0_13 = arith.constant 0 : index
    %34 = vector.load %arg5[%c0_12, %c0_13] : memref<2x256xf32, #tpu.memory_space<vmem>>, vector<2x256xf32>
    %c0_14 = arith.constant 0 : index
    %c0_15 = arith.constant 0 : index
    %35 = vector.load %arg6[%c0_14, %c0_15] : memref<16x1xi32, #tpu.memory_space<vmem>>, vector<16x1xi32>
    %36 = arith.sitofp %35 : vector<16x1xi32> to vector<16x1xf32>
    %37 = vector.extract_strided_slice %34 {offsets = [0, 0], sizes = [1, 256], strides = [1, 1]} : vector<2x256xf32> to vector<1x256xf32>
    %38 = vector.extract_strided_slice %34 {offsets = [1, 0], sizes = [1, 256], strides = [1, 1]} : vector<2x256xf32> to vector<1x256xf32>
    %39 = vector.extract_strided_slice %34 {offsets = [0, 0], sizes = [1, 256], strides = [1, 1]} : vector<2x256xf32> to vector<1x256xf32>
    %40 = arith.subf %38, %39 : vector<1x256xf32>
    %41 = vector.broadcast %36 : vector<16x1xf32> to vector<16x256xf32>
    %42 = vector.broadcast %40 : vector<1x256xf32> to vector<16x256xf32>
    %43 = arith.mulf %41, %42 : vector<16x256xf32>
    %44 = vector.broadcast %37 : vector<1x256xf32> to vector<16x256xf32>
    %45 = arith.addf %44, %43 : vector<16x256xf32>
    %46 = arith.addf %33, %45 : vector<16x256xf32>
    %cst = arith.constant dense<0.000000e+00> : vector<16xf32>
    %47 = vector.multi_reduction <add>, %46, %cst [1] : vector<16x256xf32> to vector<16xf32>
    %48 = vector.shape_cast %47 : vector<16xf32> to vector<16x1xf32>
    %cst_16 = arith.constant 2.560000e+02 : f32
    %49 = vector.broadcast %cst_16 : f32 to vector<16x1xf32>
    %50 = arith.divf %48, %49 : vector<16x1xf32>
    %51 = vector.broadcast %50 : vector<16x1xf32> to vector<16x256xf32>
    %52 = arith.subf %46, %51 : vector<16x256xf32>
    %53 = arith.mulf %52, %52 : vector<16x256xf32>
    %cst_17 = arith.constant dense<0.000000e+00> : vector<16xf32>
    %54 = vector.multi_reduction <add>, %53, %cst_17 [1] : vector<16x256xf32> to vector<16xf32>
    %55 = vector.shape_cast %54 : vector<16xf32> to vector<16x1xf32>
    %cst_18 = arith.constant 2.560000e+02 : f32
    %56 = vector.broadcast %cst_18 : f32 to vector<16x1xf32>
    %57 = arith.divf %55, %56 : vector<16x1xf32>
    %cst_19 = arith.constant 9.99999996E-13 : f32
    %58 = vector.broadcast %cst_19 : f32 to vector<16x1xf32>
    %59 = arith.addf %57, %58 : vector<16x1xf32>
    %60 = math.rsqrt %59 : vector<16x1xf32>
    %61 = vector.broadcast %60 : vector<16x1xf32> to vector<16x256xf32>
    %62 = arith.mulf %52, %61 : vector<16x256xf32>
    %c0_20 = arith.constant 0 : index
    %c0_21 = arith.constant 0 : index
    %63 = vector.load %arg7[%c0_20, %c0_21] : memref<1x256xf32, #tpu.memory_space<vmem>>, vector<1x256xf32>
    %64 = vector.broadcast %63 : vector<1x256xf32> to vector<16x256xf32>
    %65 = arith.mulf %62, %64 : vector<16x256xf32>
    %c0_22 = arith.constant 0 : index
    %c0_23 = arith.constant 0 : index
    %66 = vector.load %arg8[%c0_22, %c0_23] : memref<1x256xf32, #tpu.memory_space<vmem>>, vector<1x256xf32>
    %67 = vector.broadcast %66 : vector<1x256xf32> to vector<16x256xf32>
    %68 = arith.addf %65, %67 : vector<16x256xf32>
    %c0_24 = arith.constant 0 : index
    %c0_25 = arith.constant 0 : index
    %69 = vector.load %arg9[%c0_24, %c0_25] : memref<16x256xf32, #tpu.memory_space<vmem>>, vector<16x256xf32>
    tpu.vector_store %arg9[%c0_24, %c0_25], %68 {strides = array<i32>} : memref<16x256xf32, #tpu.memory_space<vmem>>, vector<16x256xf32>,
    return
  }
  func.func @transform_1(%arg0: i32, %arg1: i32, %arg2: memref<32xi32, #tpu.memory_space<smem>>) -> (i32, i32) {
    %c0_i32 = arith.constant 0 : i32
    %c0_i32_0 = arith.constant 0 : i32
    return %arg0, %c0_i32 : i32, i32
  }
  func.func @transform_2(%arg0: i32, %arg1: i32, %arg2: memref<32xi32, #tpu.memory_space<smem>>) -> (i32, i32) {
    %c0_i32 = arith.constant 0 : i32
    %c0_i32_0 = arith.constant 0 : i32
    %c0_i32_1 = arith.constant 0 : i32
    return %c0_i32, %c0_i32_0 : i32, i32
  }
  func.func @transform_3(%arg0: i32, %arg1: i32, %arg2: memref<32xi32, #tpu.memory_space<smem>>) -> (i32, i32) {
    %c1_i32 = arith.constant 1 : i32
    %0 = arith.muli %arg1, %c1_i32 : i32
    %1 = arith.addi %0, %arg0 : i32
    %c0_i32 = arith.constant 0 : i32
    %c0_i32_0 = arith.constant 0 : i32
    return %1, %c0_i32 : i32, i32
  }
  func.func @transform_4(%arg0: i32, %arg1: i32, %arg2: memref<32xi32, #tpu.memory_space<smem>>) -> (i32, i32) {
    %c0_i32 = arith.constant 0 : i32
    %c0_i32_0 = arith.constant 0 : i32
    %c0_i32_1 = arith.constant 0 : i32
    return %c0_i32, %c0_i32_0 : i32, i32
  }
  func.func @transform_5(%arg0: i32, %arg1: i32, %arg2: memref<32xi32, #tpu.memory_space<smem>>) -> (i32, i32) {
    %c0_i32 = arith.constant 0 : i32
    %c0_i32_0 = arith.constant 0 : i32
    %c0_i32_1 = arith.constant 0 : i32
    return %c0_i32, %c0_i32_0 : i32, i32
  }
  func.func @transform_6(%arg0: i32, %arg1: i32, %arg2: memref<32xi32, #tpu.memory_space<smem>>) -> (i32, i32) {
    %c1_i32 = arith.constant 1 : i32
    %0 = arith.muli %arg1, %c1_i32 : i32
    %1 = arith.addi %0, %arg0 : i32
    %c0_i32 = arith.constant 0 : i32
    %c0_i32_0 = arith.constant 0 : i32
    return %1, %c0_i32 : i32, i32
  }
}

</mosaic_0001>

<bundles_post_ra>
// kernel: tpu_custom_call.1
= control target key start
LH: loop header
LB: loop body
LE: loop exit
PB: predicated region body
PF: predicated region fallthrough
CT: control target
= control target key end

     0   :  { %s3428_s0 = inlined_call_operand.vmem [shape: s32[32], index: 0, kind: input, shape index: {}]   ;;  %s3429_s1 = inlined_call_operand.hbm [shape: u32[512,128], index: 1, kind: input, shape index: {}]   ;;  %s3430_s2 = inlined_call_operand.hbm [shape: u32[64,128], index: 2, kind: input, shape index: {}]   ;;  %s3431_s3 = inlined_call_operand.vmem [shape: f32[2,256], index: 3, kind: input, shape index: {}]   ;;  %s3432_s4 = inlined_call_operand.vmem [shape: s32[32,1], index: 4, kind: input, shape index: {}]   ;;  %s3433_s5 = inlined_call_operand.vmem [shape: f32[1,256], index: 5, kind: input, shape index: {}]   ;;  %s3434_s6 = inlined_call_operand.vmem [shape: f32[1,256], index: 6, kind: input, shape index: {}]   ;;  %s3435_s7 = inlined_call_operand.hbm [shape: f32[32,256], index: 7, kind: output, shape index: {}]  }
   0x1   :  { %3453 = sst [smem:[#allocation106_spill]] %s3430_s2  ;;  %s12_s26 = sshll.u32 %s3428_s0, 4  ;;  %s13_s26 = int_to_ptr.vmem [resolvable:$true] %s12_s26 }
   0x2   :  { %3454 = sst [smem:[#allocation107_spill]] %s3432_s4  ;;  %s1440_s27 = scalar_lea.vmem %s13_s26, 16 }
   0x3   :  { %3455 = sst [smem:[#allocation108_spill]] %s3435_s7  ;;  %p1441_p0 = scmp.ne.s32.totalorder %s13_s26, %s1440_s27 }
   0x4   :  { %p1445_p1 = scmp.lt.s32.totalorder %s13_s26, %s13_s26  ;;  %p1446_p2 = scmp.lt.s32.totalorder %s1440_s27, %s1440_s27 }
   0x6   :  { %p1447_p3 = por %p1446_p2, %p1445_p1 }
   0x8   :  { %p1448_p4 = pnand %p1447_p3, %p1441_p0 }
   0xa   :  { %1451 = shalt.err (!%p1448_p4)  }
   0xb   :  { %s2400_s28 = smov [#allocation5]  }
   0xc   :  { %15 = dma.vmem_to_smem %s13_s26, 16, %s2400_s28, [#allocation4] }
   0xd   :  { %2364 = dma.done.wait [#allocation4], 16 }
   0xe   :  { %2365 = vsyncadd [#allocation4], 4294967280 }
   0xf   :  { %17 = sfence }
  0x10   :  { %18 = vsyncpa [#allocation7], 0 }
  0x11   :  { %19 = vsyncpa [#allocation8], 0 }
  0x12   :  { %21 = vsyncpa [#allocation8 + $0x1], 0  ;;  %s2467_s29 = smov 0   ;;  %s2469_s30 = smov 0  }
  0x13   :  { %s2471_s0 = smov 0   ;;  %s2473_s8 = smov 0  }
  0x14   :  { %s2475_s9 = smov 0   ;;  %s2477_s10 = smov 0  }
  0x15 LB: > { %3456 = sst [smem:[#allocation96_spill]] %s2378_s29  ;;  %s1224_s11 = sadd.s32 4294967295, %s2398_s10   ;;  %s2398_s10 = sphi %s2477_s10, %s27_s10   ;;  %s2394_s9 = sphi %s2475_s9, %s3490_s9   ;;  %s2390_s8 = sphi %s2473_s8, %s3489_s8   ;;  %s2386_s0 = sphi %s2471_s0, %s3488_s0   ;;  %s2382_s30 = sphi %s2469_s30, %s3487_s30   ;;  %s2378_s29 = sphi %s2467_s29, %s3486_s29  }
  0x16   : > { %3457 = sst [smem:[#allocation97_spill]] %s2382_s30  ;;  %s1225_s12 = sadd.s32 4294967294, %s2398_s10  }
  0x17   : > { %3458 = sst [smem:[#allocation98_spill]] %s2386_s0  ;;  %s36_s13 = sadd.s32 1, %s2394_s9 }
  0x18   : > { %3459 = sst [smem:[#allocation99_spill]] %s2394_s9  ;;  %s165_s14 = sadd.s32 1, %s2386_s0 }
  0x19   : > { %3460 = sst [smem:[#allocation100_spill]] %s2398_s10  ;;  %p37_p5 = scmp.ge.s32.totalorder %s36_s13, 2 }
  0x1a   : > { %p175_p6 = scmp.ne.s32.totalorder %s2386_s0, %s2382_s30  ;;  %p176_p7 = scmp.eq.s32.totalorder %s1224_s11, 1 }
  0x1b   : > { %p181_p8 = scmp.ne.s32.totalorder %s2382_s30, %s2378_s29  ;;  %s3492_s13 = smov (%p37_p5, %s36_s13), 0 }
  0x1c   : > { %3461 = sst [smem:[#allocation101_spill]] %s3492_s13  ;;  %p2507_p9 = por %p176_p7, %p175_p6 }
  0x1d   : > { %p182_p10 = scmp.eq.s32.totalorder %s1225_s12, 1  ;;  %s162_s16 = ssub.s32 %s2394_s9, %s3492_s13 }
  0x1e   : > { %s3462_s15 = scalar_select %p2507_p9, 1, 0 }
  0x1f   : > { %p1226_p11 = scmp.ge.s32.totalorder %s2398_s10, 1  ;;  %p163_p12 = scmp.eq.s32.totalorder %s162_s16, 0 }
  0x20   : > { %3463 = sst [smem:[#allocation102_spill]] %s3462_s15  ;;  %p2514_p13 = por %p182_p10, %p181_p8 }
  0x21   : > { %p189_p0 = scmp.lt.s32.totalorder %s2398_s10, 3  ;;  %p2526_p2 = scmp.eq.s32.totalorder %s1224_s11, 0 }
  0x22   : > { %s3464_s17 = scalar_select %p2514_p13, 1, 0 }
  0x23   : > { %s2520_s18 = scalar_select %p163_p12, %s2386_s0, %s165_s14  }
  0x24   : > { %3465 = sst [smem:[#allocation103_spill]] %s3464_s17  ;;  %p2522_p1 = pnand %p1226_p11, %p189_p0 }
  0x25   : > { %3466 = sst [smem:[#allocation104_spill]] %s2520_s18  ;;  %s2401_s21 = smov [#allocation6]  }
  0x26   : > { %s3467_s19 = scalar_select %p2522_p1, 1, 0 }
  0x27   : > { %s3468_s20 = scalar_select %p2526_p2, 1, 0 }
  0x28   : > { %p1352_p3 = pneg %p2522_p1  ;;  %s204_s22 = sshll.u32 %s2401_s21, 4  ;;  %s205_s22 = int_to_ptr.vmem [resolvable:$true] %s204_s22 }
  0x29   : > { %s3470_s2 = sld [smem:[#allocation106_spill]] }
  0x2a   : > { %p2534_p4 = pnand %p2526_p2, %p1352_p3 }
  0x2c   : > { %p1454_p6 = pneg %p2534_p4 }
  0x2f   : > { %s1452_s26 = scalar_lea.hbm %s3470_s2, 256  ;;  %s1457_s14 = scalar_lea.hbm %s3470_s2, 1024 }
  0x30   : > { %p1453_p5 = scmp.ne.s32.totalorder %s3470_s2, %s1452_s26  ;;  %p1458_p10 = scmp.lt.u32.totalorder %s1457_s14, %s1452_s26 }
  0x31   : > { %p1459_p11 = scmp.lt.u32.totalorder %s1452_s26, %s3470_s2 }
  0x32   : > { %p1455_p7 = pnand %p1454_p6, %p1453_p5 }
  0x33   : > { %p1460_p12 = por %p1459_p11, %p1458_p10 }
  0x34   : > { %p1456_p8 = pneg %p1455_p7 }
  0x36   : > { %p1461_p0 = pnand %p1460_p12, %p1456_p8 }
  0x38   : > { %1464 = shalt.err (!%p1461_p0)
}
  0x39   : > { %s1465_s24 = scalar_lea.vmem %s205_s22, 256  ;;  %p1473_p2 = scmp.lt.s32.totalorder %s205_s22, %s205_s22 }
  0x3a   : > { %p1466_p3 = scmp.ne.s32.totalorder %s205_s22, %s1465_s24  ;;  %p1474_p1 = scmp.lt.s32.totalorder %s1465_s24, %s1465_s24 }
  0x3c   : > { %p1468_p13 = pnand %p1466_p3, %p1454_p6  ;;  %p1475_p5 = por %p1474_p1, %p1473_p2 }
  0x3e   : > { %p1469_p9 = pneg %p1468_p13 }
  0x40   : > { %p1476_p7 = pnand %p1475_p5, %p1469_p9 }
  0x42   : > { %1479 = shalt.err (!%p1476_p7)
}
  0x43   : > { %s2402_s25 = smov 128   ;;  %s2403_s27 = smov 8  }
  0x44   : > { %1355 = dma.hbm_to_vmem [thread:$0]  (!%p2534_p4), %s3470_s2, 256, %s205_s22, [#allocation7], %s2402_s25, %s2402_s25, %s2403_s27  }
  0x45   : > { %p3471_p8 = scmp.ne.s32.totalorder %s3467_s19, 0 }
  0x47   : > { %240 = sbr.rel (%p3471_p8) target bundleno = 1346 (0x542), region = 40 }
  0x4e   : > { %p3472_p10 = scmp.ne.s32.totalorder %s3468_s20, 0 }
  0x50   : > { %2367 = dma.done.wait (%p3472_p10), [#allocation7], 256  }
  0x51   : > { %2369 = vsyncadd (%p3472_p10), [#allocation7], 4294967040  ;;  %s3440_s23 = sand.u32 1, %s2382_s30   ;;  %s1232_s26 = sshll.u32 %s2390_s8, 1 }
  0x52   : > { %s2567_s19 = sshll.u32 %s3440_s23, 5  ;;  %p272_p9 = scmp.lt.s32.totalorder %s1232_s26, 3 }
  0x53   : > { %s2570_s22 = sand.u32 1, %s2390_s8  ;;  %p1362_p13 = scmp.eq.s32.totalorder %s2390_s8, 0 }
  0x54   : > { %s3494_s26 = smov (!%p272_p9, %s1232_s26), 3  ;;  %s2574_s12 = sshll.u32 %s2390_s8, 4 }
  0x55   : > { %s1233_s20 = sshll.u32 %s3494_s26, 3  ;;  %s3473_s4 = sld [smem:[#allocation107_spill]] }
  0x56   : > { %s1302_s24 = scalar_select %p1362_p13, [#allocation5], [#allocation76] }
  0x57   : > { %s1303_s25 = scalar_select %p1362_p13, %s2574_s12, 0 }
  0x58   : > { %s2404_s27 = smov [#allocation2]   ;;  %s303_s11 = sadd.s32 1, %s2574_s12 }
  0x59   : > { %s299_s28 = sshll.u32 %s2404_s27, 4  ;;  %s289_s23 = sld [smem:[%s1302_s24 + %s1303_s25]]  ;;  %s2587_s28 = int_to_ptr.vmem [resolvable:$true] %s299_s28 }
  0x5a   : > { %s1305_s26 = scalar_select %p1362_p13, [#allocation5], [#allocation77] }
  0x5b   : > { %s2579_s21 = scalar_lea.vmem %s3473_s4, %s1233_s20  ;;  %s3496_s11 = smov (!%p1362_p13, %s303_s11), 0 }
  0x5c   : > { %s2594_s16 = sld [smem:[%s1305_s26 + %s3496_s11]]  ;;  %s2405_s20 = smov [#allocation2 + $0x1]  }
  0x5d   : > { %s315_s2 = sshll.u32 %s2405_s20, 4  ;;  %s2406_s13 = smov [#allocation2 + $0x2]   ;;  %s2596_s2 = int_to_ptr.vmem [resolvable:$true] %s315_s2 }
  0x5e   : > { %s331_s9 = sshll.u32 %s2406_s13, 4  ;;  %s2608_s20 = scalar_lea.hbm %s3429_s1, 8192  ;;  %s2601_s9 = int_to_ptr.vmem [resolvable:$true] %s331_s9 }
  0x5f   : > { %s1236_s4 = sshll.u32 %s289_s23, 4 }
  0x60   : > { %s291_s24 = scalar_lea.hbm %s3429_s1, %s1236_s4 }
  0x61   : > { %s1480_s25 = scalar_lea.hbm %s291_s24, 16  ;;  %p1485_p6 = scmp.lt.u32.totalorder %s291_s24, %s3429_s1 }
  0x62   : > { %p1481_p1 = scmp.ne.s32.totalorder %s291_s24, %s1480_s25  ;;  %p1486_p11 = scmp.lt.u32.totalorder %s2608_s20, %s1480_s25 }
  0x63   : > { %p1488_p0 = scmp.lt.u32.totalorder %s1480_s25, %s291_s24 }
  0x64   : > { %p1482_p2 = pnand %p1481_p1, %p1362_p13  ;;  %p1487_p12 = por %p1486_p11, %p1485_p6 }
  0x66   : > { %p1483_p4 = pneg %p1482_p2  ;;  %p1489_p3 = por %p1488_p0, %p1487_p12 }
  0x68   : > { %p1490_p5 = pnand %p1489_p3, %p1483_p4 }
  0x6a   : > { %1493 = shalt.err (!%p1490_p5)  }
  0x6b   : > { %s1494_s4 = scalar_lea.vmem %s2587_s28, 16  ;;  %s2619_s13 = scalar_lea.vmem %s2587_s28, 512 }
  0x6c   : > { %p1495_p7 = scmp.ne.s32.totalorder %s2587_s28, %s1494_s4  ;;  %p1501_p9 = scmp.lt.s32.totalorder %s2587_s28, %s2587_s28 }
  0x6d   : > { %p1502_p1 = scmp.lt.s32.totalorder %s2619_s13, %s1494_s4 }
  0x6e   : > { %p1496_p8 = pnand %p1495_p7, %p1362_p13 }
  0x6f   : > { %p1503_p2 = por %p1502_p1, %p1501_p9 }
  0x70   : > { %p1497_p10 = pneg %p1496_p8 }
  0x72   : > { %p1504_p6 = pnand %p1503_p2, %p1497_p10 }
  0x74   : > { %1507 = shalt.err (!%p1504_p6)  }
  0x75   : > { %1304 = dma.hbm_to_vmem [thread:$0]  (%p1362_p13), %s291_s24, 16, %s2587_s28, [#allocation3] }
  0x76   : > { %s1308_s18 = scalar_select %p1362_p13, [#allocation5], [#allocation78] }
  0x77   : > { %s1237_s14 = sshll.u32 %s2594_s16, 4  ;;  %s335_s27 = sadd.s32 3, %s2574_s12 }
  0x78   : > { %s306_s26 = scalar_lea.hbm %s3429_s1, %s1237_s14 }
  0x79   : > { %s1508_s23 = scalar_lea.hbm %s306_s26, 16  ;;  %p1513_p0 = scmp.lt.u32.totalorder %s306_s26, %s3429_s1 }
  0x7a   : > { %p1509_p4 = scmp.ne.s32.totalorder %s306_s26, %s1508_s23  ;;  %p1514_p3 = scmp.lt.u32.totalorder %s2608_s20, %s1508_s23 }
  0x7b   : > { %p1516_p7 = scmp.lt.u32.totalorder %s1508_s23, %s306_s26 }
  0x7c   : > { %p1510_p11 = pnand %p1509_p4, %p1362_p13  ;;  %p1515_p5 = por %p1514_p3, %p1513_p0 }
  0x7e   : > { %p1511_p12 = pneg %p1510_p11  ;;  %p1517_p8 = por %p1516_p7, %p1515_p5 }
  0x80   : > { %p1518_p10 = pnand %p1517_p8, %p1511_p12 }
  0x82   : > { %1521 = shalt.err (!%p1518_p10)  }
  0x83   : > { %s1522_s16 = scalar_lea.vmem %s2596_s2, 16  ;;  %p1529_p6 = scmp.lt.s32.totalorder %s2596_s2, %s2587_s28 }
  0x84   : > { %p1523_p9 = scmp.ne.s32.totalorder %s2596_s2, %s1522_s16  ;;  %p1530_p4 = scmp.lt.s32.totalorder %s2619_s13, %s1522_s16 }
  0x86   : > { %p1524_p1 = pnand %p1523_p9, %p1362_p13  ;;  %p1531_p11 = por %p1530_p4, %p1529_p6 }
  0x88   : > { %p1525_p2 = pneg %p1524_p1 }
  0x8a   : > { %p1532_p0 = pnand %p1531_p11, %p1525_p2 }
  0x8c   : > { %1535 = shalt.err (!%p1532_p0)  }
  0x8d   : > { %1307 = dma.hbm_to_vmem [thread:$0]  (%p1362_p13), %s306_s26, 16, %s2596_s2, [#allocation3] }
  0x8e   : > { %s3474_s0 = sadd.s32 2, %s2574_s12  ;;  %s2407_s25 = smov [#allocation2 + $0x3]  }
  0x8f   : > { %s3498_s0 = smov (!%p1362_p13, %s3474_s0), 0  ;;  %s347_s11 = sshll.u32 %s2407_s25, 4  ;;  %s2658_s11 = int_to_ptr.vmem [resolvable:$true] %s347_s11 }
  0x90   : > { %s1311_s24 = scalar_select %p1362_p13, [#allocation5], [#allocation79] }
  0x91   : > { %s320_s14 = sld [smem:[%s1308_s18 + %s3498_s0]]  ;;  %s3500_s27 = smov (!%p1362_p13, %s335_s27), 0 }
  0x92   : > { %s351_s23 = sadd.s32 4, %s2574_s12  ;;  %s2661_s4 = sld [smem:[%s1311_s24 + %s3500_s27]] }
  0x93   : > { %s1314_s16 = scalar_select %p1362_p13, [#allocation5], [#allocation80] }
  0x94   : > { %s3502_s23 = smov (!%p1362_p13, %s351_s23), 0  ;;  %s2408_s26 = smov [#allocation2 + $0x4]  }
  0x95   : > { %s363_s17 = sshll.u32 %s2408_s26, 4  ;;  %s2670_s25 = sld [smem:[%s1314_s16 + %s3502_s23]]  ;;  %s2689_s17 = int_to_ptr.vmem [resolvable:$true] %s363_s17 }
  0x97   : > { %s1238_s2 = sshll.u32 %s320_s14, 4 }
  0x98   : > { %s322_s0 = scalar_lea.hbm %s3429_s1, %s1238_s2 }
  0x99   : > { %s1536_s10 = scalar_lea.hbm %s322_s0, 16  ;;  %p1541_p7 = scmp.lt.u32.totalorder %s322_s0, %s3429_s1 }
  0x9a   : > { %p1537_p12 = scmp.ne.s32.totalorder %s322_s0, %s1536_s10  ;;  %p1542_p8 = scmp.lt.u32.totalorder %s2608_s20, %s1536_s10 }
  0x9b   : > { %p1544_p9 = scmp.lt.u32.totalorder %s1536_s10, %s322_s0 }
  0x9c   : > { %p1538_p3 = pnand %p1537_p12, %p1362_p13  ;;  %p1543_p10 = por %p1542_p8, %p1541_p7 }
  0x9e   : > { %p1539_p5 = pneg %p1538_p3  ;;  %p1545_p1 = por %p1544_p9, %p1543_p10 }
  0xa0   : > { %p1546_p2 = pnand %p1545_p1, %p1539_p5 }
  0xa2   : > { %1549 = shalt.err (!%p1546_p2)  }
  0xa3   : > { %s1550_s29 = scalar_lea.vmem %s2601_s9, 16  ;;  %p1557_p0 = scmp.lt.s32.totalorder %s2601_s9, %s2587_s28 }
  0xa4   : > { %p1551_p6 = scmp.ne.s32.totalorder %s2601_s9, %s1550_s29  ;;  %p1558_p12 = scmp.lt.s32.totalorder %s2619_s13, %s1550_s29 }
  0xa6   : > { %p1552_p4 = pnand %p1551_p6, %p1362_p13  ;;  %p1559_p3 = por %p1558_p12, %p1557_p0 }
  0xa8   : > { %p1553_p11 = pneg %p1552_p4 }
  0xaa   : > { %p1560_p7 = pnand %p1559_p3, %p1553_p11 }
  0xac   : > { %1563 = shalt.err (!%p1560_p7)  }
  0xad   : > { %1310 = dma.hbm_to_vmem [thread:$0]  (%p1362_p13), %s322_s0, 16, %s2601_s9, [#allocation3] }
  0xae   : > { %s1239_s10 = sshll.u32 %s2661_s4, 4  ;;  %s367_s2 = sadd.s32 5, %s2574_s12 }
  0xaf   : > { %s338_s16 = scalar_lea.hbm %s3429_s1, %s1239_s10 }
  0xb0   : > { %s1564_s26 = scalar_lea.hbm %s338_s16, 16  ;;  %p1569_p9 = scmp.lt.u32.totalorder %s338_s16, %s3429_s1 }
  0xb1   : > { %p1565_p5 = scmp.ne.s32.totalorder %s338_s16, %s1564_s26  ;;  %p1570_p1 = scmp.lt.u32.totalorder %s2608_s20, %s1564_s26 }
  0xb2   : > { %p1572_p6 = scmp.lt.u32.totalorder %s1564_s26, %s338_s16 }
  0xb3   : > { %p1566_p8 = pnand %p1565_p5, %p1362_p13  ;;  %p1571_p2 = por %p1570_p1, %p1569_p9 }
  0xb5   : > { %p1567_p10 = pneg %p1566_p8  ;;  %p1573_p4 = por %p1572_p6, %p1571_p2 }
  0xb7   : > { %p1574_p11 = pnand %p1573_p4, %p1567_p10 }
  0xb9   : > { %1577 = shalt.err (!%p1574_p11)  }
  0xba   : > { %s1578_s9 = scalar_lea.vmem %s2658_s11, 16  ;;  %p1585_p7 = scmp.lt.s32.totalorder %s2658_s11, %s2587_s28 }
  0xbb   : > { %p1579_p0 = scmp.ne.s32.totalorder %s2658_s11, %s1578_s9  ;;  %p1586_p5 = scmp.lt.s32.totalorder %s2619_s13, %s1578_s9 }
  0xbd   : > { %p1580_p12 = pnand %p1579_p0, %p1362_p13  ;;  %p1587_p8 = por %p1586_p5, %p1585_p7 }
  0xbf   : > { %p1581_p3 = pneg %p1580_p12 }
  0xc1   : > { %p1588_p1 = pnand %p1587_p8, %p1581_p3 }
  0xc3   : > { %1591 = shalt.err (!%p1588_p1)  }
  0xc4   : > { %1313 = dma.hbm_to_vmem [thread:$0]  (%p1362_p13), %s338_s16, 16, %s2658_s11, [#allocation3] }
  0xc5   : > { %s2713_s4 = scalar_select %p1362_p13, [#allocation5], [#allocation81] }
  0xc6   : > { %s1240_s0 = sshll.u32 %s2670_s25, 4  ;;  %s2409_s14 = smov [#allocation2 + $0x5]  }
  0xc7   : > { %s354_s10 = scalar_lea.hbm %s3429_s1, %s1240_s0  ;;  %s379_s23 = sshll.u32 %s2409_s14, 4  ;;  %s2739_s23 = int_to_ptr.vmem [resolvable:$true] %s379_s23 }
  0xc8   : > { %s1592_s26 = scalar_lea.hbm %s354_s10, 16  ;;  %p1597_p6 = scmp.lt.u32.totalorder %s354_s10, %s3429_s1 }
  0xc9   : > { %p1593_p10 = scmp.ne.s32.totalorder %s354_s10, %s1592_s26  ;;  %p1598_p4 = scmp.lt.u32.totalorder %s2608_s20, %s1592_s26 }
  0xca   : > { %p1600_p0 = scmp.lt.u32.totalorder %s1592_s26, %s354_s10 }
  0xcb   : > { %p1594_p9 = pnand %p1593_p10, %p1362_p13  ;;  %p1599_p11 = por %p1598_p4, %p1597_p6 }
  0xcd   : > { %p1595_p2 = pneg %p1594_p9  ;;  %p1601_p12 = por %p1600_p0, %p1599_p11 }
  0xcf   : > { %p1602_p3 = pnand %p1601_p12, %p1595_p2 }
  0xd1   : > { %1605 = shalt.err (!%p1602_p3)  }
  0xd2   : > { %s1606_s11 = scalar_lea.vmem %s2689_s17, 16  ;;  %p1613_p1 = scmp.lt.s32.totalorder %s2689_s17, %s2587_s28 }
  0xd3   : > { %p1607_p7 = scmp.ne.s32.totalorder %s2689_s17, %s1606_s11  ;;  %p1614_p10 = scmp.lt.s32.totalorder %s2619_s13, %s1606_s11 }
  0xd5   : > { %p1608_p5 = pnand %p1607_p7, %p1362_p13  ;;  %p1615_p9 = por %p1614_p10, %p1613_p1 }
  0xd7   : > { %p1609_p8 = pneg %p1608_p5 }
  0xd9   : > { %p1616_p4 = pnand %p1615_p9, %p1609_p8 }
  0xdb   : > { %1619 = shalt.err (!%p1616_p4)  }
  0xdc   : > { %1316 = dma.hbm_to_vmem [thread:$0]  (%p1362_p13), %s354_s10, 16, %s2689_s17, [#allocation3] }
  0xdd   : > { %s3504_s2 = smov (!%p1362_p13, %s367_s2), 0  ;;  %s383_s25 = sadd.s32 6, %s2574_s12 }
  0xde   : > { %s368_s16 = sld [smem:[%s2713_s4 + %s3504_s2]]  ;;  %s3506_s25 = smov (!%p1362_p13, %s383_s25), 0 }
  0xdf   : > { %s1320_s9 = scalar_select %p1362_p13, [#allocation5], [#allocation82] }
  0xe0   : > { %s2410_s0 = smov [#allocation2 + $0x6]   ;;  %s399_s29 = sadd.s32 7, %s2574_s12 }
  0xe1   : > { %s395_s24 = sshll.u32 %s2410_s0, 4  ;;  %s2748_s14 = sld [smem:[%s1320_s9 + %s3506_s25]]  ;;  %s2750_s24 = int_to_ptr.vmem [resolvable:$true] %s395_s24 }
  0xe2   : > { %s2754_s17 = scalar_select %p1362_p13, [#allocation5], [#allocation83] }
  0xe3   : > { %s2411_s4 = smov [#allocation2 + $0x7]  }
  0xe4   : > { %s1241_s10 = sshll.u32 %s368_s16, 4  ;;  %s411_s27 = sshll.u32 %s2411_s4, 4  ;;  %s2780_s27 = int_to_ptr.vmem [resolvable:$true] %s411_s27 }
  0xe5   : > { %s370_s2 = scalar_lea.hbm %s3429_s1, %s1241_s10 }
  0xe6   : > { %s1620_s11 = scalar_lea.hbm %s370_s2, 16  ;;  %p1625_p0 = scmp.lt.u32.totalorder %s370_s2, %s3429_s1 }
  0xe7   : > { %p1621_p2 = scmp.ne.s32.totalorder %s370_s2, %s1620_s11  ;;  %p1626_p12 = scmp.lt.u32.totalorder %s2608_s20, %s1620_s11 }
  0xe8   : > { %p1628_p7 = scmp.lt.u32.totalorder %s1620_s11, %s370_s2 }
  0xe9   : > { %p1622_p6 = pnand %p1621_p2, %p1362_p13  ;;  %p1627_p3 = por %p1626_p12, %p1625_p0 }
  0xeb   : > { %p1623_p11 = pneg %p1622_p6  ;;  %p1629_p5 = por %p1628_p7, %p1627_p3 }
  0xed   : > { %p1630_p8 = pnand %p1629_p5, %p1623_p11 }
  0xef   : > { %1633 = shalt.err (!%p1630_p8)  }
  0xf0   : > { %s1634_s16 = scalar_lea.vmem %s2739_s23, 16  ;;  %p1641_p4 = scmp.lt.s32.totalorder %s2739_s23, %s2587_s28 }
  0xf1   : > { %p1635_p1 = scmp.ne.s32.totalorder %s2739_s23, %s1634_s16  ;;  %p1642_p2 = scmp.lt.s32.totalorder %s2619_s13, %s1634_s16 }
  0xf3   : > { %p1636_p10 = pnand %p1635_p1, %p1362_p13  ;;  %p1643_p6 = por %p1642_p2, %p1641_p4 }
  0xf5   : > { %p1637_p9 = pneg %p1636_p10 }
  0xf7   : > { %p1644_p0 = pnand %p1643_p6, %p1637_p9 }
  0xf9   : > { %1647 = shalt.err (!%p1644_p0)  }
  0xfa   : > { %1319 = dma.hbm_to_vmem [thread:$0]  (%p1362_p13), %s370_s2, 16, %s2739_s23, [#allocation3] }
  0xfb   : > { %s3508_s29 = smov (!%p1362_p13, %s399_s29), 0  ;;  %s1242_s9 = sshll.u32 %s2748_s14, 4 }
  0xfc   : > { %s386_s18 = scalar_lea.hbm %s3429_s1, %s1242_s9  ;;  %s2786_s4 = sld [smem:[%s2754_s17 + %s3508_s29]] }
  0xfd   : > { %s1648_s11 = scalar_lea.hbm %s386_s18, 16  ;;  %p1653_p7 = scmp.lt.u32.totalorder %s386_s18, %s3429_s1 }
  0xfe   : > { %p1649_p11 = scmp.ne.s32.totalorder %s386_s18, %s1648_s11  ;;  %p1654_p5 = scmp.lt.u32.totalorder %s2608_s20, %s1648_s11 }
  0xff   : > { %p1656_p1 = scmp.lt.u32.totalorder %s1648_s11, %s386_s18 }
 0x100   : > { %p1650_p12 = pnand %p1649_p11, %p1362_p13  ;;  %p1655_p8 = por %p1654_p5, %p1653_p7 }
 0x102   : > { %p1651_p3 = pneg %p1650_p12  ;;  %p1657_p10 = por %p1656_p1, %p1655_p8 }
 0x104   : > { %p1658_p9 = pnand %p1657_p10, %p1651_p3 }
 0x106   : > { %1661 = shalt.err (!%p1658_p9)  }
 0x107   : > { %s1662_s23 = scalar_lea.vmem %s2750_s24, 16  ;;  %p1669_p0 = scmp.lt.s32.totalorder %s2750_s24, %s2587_s28 }
 0x108   : > { %p1663_p4 = scmp.ne.s32.totalorder %s2750_s24, %s1662_s23  ;;  %p1670_p11 = scmp.lt.s32.totalorder %s2619_s13, %s1662_s23 }
 0x10a   : > { %p1664_p2 = pnand %p1663_p4, %p1362_p13  ;;  %p1671_p12 = por %p1670_p11, %p1669_p0 }
 0x10c   : > { %p1665_p6 = pneg %p1664_p2 }
 0x10e   : > { %p1672_p5 = pnand %p1671_p12, %p1665_p6 }
 0x110   : > { %1675 = shalt.err (!%p1672_p5)  }
 0x111   : > { %1322 = dma.hbm_to_vmem [thread:$0]  (%p1362_p13), %s386_s18, 16, %s2750_s24, [#allocation3] }
 0x112   : > { %s415_s29 = sadd.s32 8, %s2574_s12  ;;  %s2412_s17 = smov [#allocation2 + $0x8]  }
 0x113   : > { %s1326_s14 = scalar_select %p1362_p13, [#allocation5], [#allocation84] }
 0x114   : > { %s3510_s29 = smov (!%p1362_p13, %s415_s29), 0  ;;  %s427_s2 = sshll.u32 %s2412_s17, 4  ;;  %s2816_s2 = int_to_ptr.vmem [resolvable:$true] %s427_s2 }
 0x115   : > { %s431_s16 = sadd.s32 9, %s2574_s12  ;;  %s1243_s9 = sshll.u32 %s2786_s4, 4 }
 0x116   : > { %s2811_s10 = sld [smem:[%s1326_s14 + %s3510_s29]]  ;;  %s402_s0 = scalar_lea.hbm %s3429_s1, %s1243_s9 }
 0x117   : > { %s1676_s25 = scalar_lea.hbm %s402_s0, 16  ;;  %p1681_p1 = scmp.lt.u32.totalorder %s402_s0, %s3429_s1 }
 0x118   : > { %p1677_p3 = scmp.ne.s32.totalorder %s402_s0, %s1676_s25  ;;  %p1682_p10 = scmp.lt.u32.totalorder %s2608_s20, %s1676_s25 }
 0x119   : > { %p1684_p4 = scmp.lt.u32.totalorder %s1676_s25, %s402_s0 }
 0x11a   : > { %p1678_p7 = pnand %p1677_p3, %p1362_p13  ;;  %p1683_p9 = por %p1682_p10, %p1681_p1 }
 0x11c   : > { %p1679_p8 = pneg %p1678_p7  ;;  %p1685_p2 = por %p1684_p4, %p1683_p9 }
 0x11e   : > { %p1686_p6 = pnand %p1685_p2, %p1679_p8 }
 0x120   : > { %1689 = shalt.err (!%p1686_p6)  }
 0x121   : > { %s1690_s4 = scalar_lea.vmem %s2780_s27, 16  ;;  %p1697_p5 = scmp.lt.s32.totalorder %s2780_s27, %s2587_s28 }
 0x122   : > { %p1691_p0 = scmp.ne.s32.totalorder %s2780_s27, %s1690_s4  ;;  %p1698_p3 = scmp.lt.s32.totalorder %s2619_s13, %s1690_s4 }
 0x124   : > { %p1692_p11 = pnand %p1691_p0, %p1362_p13  ;;  %p1699_p7 = por %p1698_p3, %p1697_p5 }
 0x126   : > { %p1693_p12 = pneg %p1692_p11 }
 0x128   : > { %p1700_p1 = pnand %p1699_p7, %p1693_p12 }
 0x12a   : > { %1703 = shalt.err (!%p1700_p1)  }
 0x12b   : > { %1325 = dma.hbm_to_vmem [thread:$0]  (%p1362_p13), %s402_s0, 16, %s2780_s27, [#allocation3] }
 0x12c   : > { %s1329_s23 = scalar_select %p1362_p13, [#allocation5], [#allocation85] }
 0x12d   : > { %s3512_s16 = smov (!%p1362_p13, %s431_s16), 0  ;;  %s447_s29 = sadd.s32 10, %s2574_s12 }
 0x12e   : > { %s1244_s14 = sshll.u32 %s2811_s10, 4  ;;  %s2840_s17 = sld [smem:[%s1329_s23 + %s3512_s16]] }
 0x12f   : > { %s418_s11 = scalar_lea.hbm %s3429_s1, %s1244_s14  ;;  %s2413_s25 = smov [#allocation2 + $0x9]  }
 0x130   : > { %s443_s24 = sshll.u32 %s2413_s25, 4  ;;  %s1704_s18 = scalar_lea.hbm %s418_s11, 16  ;;  %s444_s24 = int_to_ptr.vmem [resolvable:$true] %s443_s24 }
 0x131   : > { %p1705_p8 = scmp.ne.s32.totalorder %s418_s11, %s1704_s18  ;;  %p1709_p4 = scmp.lt.u32.totalorder %s418_s11, %s3429_s1 }
 0x132   : > { %p1710_p2 = scmp.lt.u32.totalorder %s2608_s20, %s1704_s18  ;;  %p1712_p0 = scmp.lt.u32.totalorder %s1704_s18, %s418_s11 }
 0x133   : > { %p1706_p10 = pnand %p1705_p8, %p1362_p13 }
 0x134   : > { %p1711_p6 = por %p1710_p2, %p1709_p4 }
 0x135   : > { %p1707_p9 = pneg %p1706_p10 }
 0x136   : > { %p1713_p11 = por %p1712_p0, %p1711_p6 }
 0x138   : > { %p1714_p12 = pnand %p1713_p11, %p1707_p9 }
 0x13a   : > { %1717 = shalt.err (!%p1714_p12)  }
 0x13b   : > { %s1718_s16 = scalar_lea.vmem %s2816_s2, 16  ;;  %p1725_p1 = scmp.lt.s32.totalorder %s2816_s2, %s2587_s28 }
 0x13c   : > { %p1719_p5 = scmp.ne.s32.totalorder %s2816_s2, %s1718_s16  ;;  %p1726_p8 = scmp.lt.s32.totalorder %s2619_s13, %s1718_s16 }
 0x13e   : > { %p1720_p3 = pnand %p1719_p5, %p1362_p13  ;;  %p1727_p10 = por %p1726_p8, %p1725_p1 }
 0x140   : > { %p1721_p7 = pneg %p1720_p3 }
 0x142   : > { %p1728_p2 = pnand %p1727_p10, %p1721_p7 }
 0x144   : > { %1731 = shalt.err (!%p1728_p2)  }
 0x145   : > { %1328 = dma.hbm_to_vmem [thread:$0]  (%p1362_p13), %s418_s11, 16, %s2816_s2, [#allocation3] }
 0x146   : > { %s1332_s10 = scalar_select %p1362_p13, [#allocation5], [#allocation86] }
 0x147   : > { %s3514_s29 = smov (!%p1362_p13, %s447_s29), 0  ;;  %s1245_s4 = sshll.u32 %s2840_s17, 4 }
 0x148   : > { %s2414_s23 = smov [#allocation2 + $0xa]   ;;  %s434_s25 = scalar_lea.hbm %s3429_s1, %s1245_s4 }
 0x149   : > { %s459_s14 = sshll.u32 %s2414_s23, 4  ;;  %s2869_s18 = sld [smem:[%s1332_s10 + %s3514_s29]]  ;;  %s2883_s14 = int_to_ptr.vmem [resolvable:$true] %s459_s14 }
 0x14a   : > { %s1732_s27 = scalar_lea.hbm %s434_s25, 16  ;;  %p1737_p0 = scmp.lt.u32.totalorder %s434_s25, %s3429_s1 }
 0x14b   : > { %p1733_p9 = scmp.ne.s32.totalorder %s434_s25, %s1732_s27  ;;  %p1738_p11 = scmp.lt.u32.totalorder %s2608_s20, %s1732_s27 }
 0x14c   : > { %p1740_p5 = scmp.lt.u32.totalorder %s1732_s27, %s434_s25 }
 0x14d   : > { %p1734_p4 = pnand %p1733_p9, %p1362_p13  ;;  %p1739_p12 = por %p1738_p11, %p1737_p0 }
 0x14f   : > { %p1735_p6 = pneg %p1734_p4  ;;  %p1741_p3 = por %p1740_p5, %p1739_p12 }
 0x151   : > { %p1742_p7 = pnand %p1741_p3, %p1735_p6 }
 0x153   : > { %1745 = shalt.err (!%p1742_p7)  }
 0x154   : > { %s1746_s17 = scalar_lea.vmem %s444_s24, 16  ;;  %p1753_p2 = scmp.lt.s32.totalorder %s444_s24, %s2587_s28 }
 0x155   : > { %p1747_p1 = scmp.ne.s32.totalorder %s444_s24, %s1746_s17  ;;  %p1754_p9 = scmp.lt.s32.totalorder %s2619_s13, %s1746_s17 }
 0x157   : > { %p1748_p8 = pnand %p1747_p1, %p1362_p13  ;;  %p1755_p4 = por %p1754_p9, %p1753_p2 }
 0x159   : > { %p1749_p10 = pneg %p1748_p8 }
 0x15b   : > { %p1756_p0 = pnand %p1755_p4, %p1749_p10 }
 0x15d   : > { %1759 = shalt.err (!%p1756_p0)  }
 0x15e   : > { %1331 = dma.hbm_to_vmem [thread:$0]  (%p1362_p13), %s434_s25, 16, %s444_s24, [#allocation3] }
 0x15f   : > { %s463_s29 = sadd.s32 11, %s2574_s12  ;;  %s479_s16 = sadd.s32 12, %s2574_s12 }
 0x160   : > { %s1335_s0 = scalar_select %p1362_p13, [#allocation5], [#allocation87] }
 0x161   : > { %s3516_s29 = smov (!%p1362_p13, %s463_s29), 0  ;;  %s1246_s10 = sshll.u32 %s2869_s18, 4 }
 0x162   : > { %s2892_s4 = sld [smem:[%s1335_s0 + %s3516_s29]]  ;;  %s450_s26 = scalar_lea.hbm %s3429_s1, %s1246_s10 }
 0x163   : > { %s2415_s27 = smov [#allocation2 + $0xb]   ;;  %s1760_s11 = scalar_lea.hbm %s450_s26, 16 }
 0x164   : > { %s475_s2 = sshll.u32 %s2415_s27, 4  ;;  %p1761_p6 = scmp.ne.s32.totalorder %s450_s26, %s1760_s11  ;;  %s476_s2 = int_to_ptr.vmem [resolvable:$true] %s475_s2 }
 0x165   : > { %p1765_p5 = scmp.lt.u32.totalorder %s450_s26, %s3429_s1  ;;  %p1766_p3 = scmp.lt.u32.totalorder %s2608_s20, %s1760_s11 }
 0x166   : > { %p1762_p11 = pnand %p1761_p6, %p1362_p13  ;;  %p1768_p1 = scmp.lt.u32.totalorder %s1760_s11, %s450_s26 }
 0x167   : > { %p1767_p7 = por %p1766_p3, %p1765_p5 }
 0x168   : > { %p1763_p12 = pneg %p1762_p11 }
 0x169   : > { %p1769_p8 = por %p1768_p1, %p1767_p7 }
 0x16b   : > { %p1770_p10 = pnand %p1769_p8, %p1763_p12 }
 0x16d   : > { %1773 = shalt.err (!%p1770_p10)  }
 0x16e   : > { %s1774_s18 = scalar_lea.vmem %s2883_s14, 16  ;;  %p1781_p0 = scmp.lt.s32.totalorder %s2883_s14, %s2587_s28 }
 0x16f   : > { %p1775_p2 = scmp.ne.s32.totalorder %s2883_s14, %s1774_s18  ;;  %p1782_p6 = scmp.lt.s32.totalorder %s2619_s13, %s1774_s18 }
 0x171   : > { %p1776_p9 = pnand %p1775_p2, %p1362_p13  ;;  %p1783_p11 = por %p1782_p6, %p1781_p0 }
 0x173   : > { %p1777_p4 = pneg %p1776_p9 }
 0x175   : > { %p1784_p3 = pnand %p1783_p11, %p1777_p4 }
 0x177   : > { %1787 = shalt.err (!%p1784_p3)  }
 0x178   : > { %1334 = dma.hbm_to_vmem [thread:$0]  (%p1362_p13), %s450_s26, 16, %s2883_s14, [#allocation3] }
 0x179   : > { %s1338_s17 = scalar_select %p1362_p13, [#allocation5], [#allocation88] }
 0x17a   : > { %s3518_s16 = smov (!%p1362_p13, %s479_s16), 0  ;;  %s1247_s29 = sshll.u32 %s2892_s4, 4 }
 0x17b   : > { %s2416_s0 = smov [#allocation2 + $0xc]   ;;  %s466_s27 = scalar_lea.hbm %s3429_s1, %s1247_s29 }
 0x17c   : > { %s491_s10 = sshll.u32 %s2416_s0, 4  ;;  %s2921_s11 = sld [smem:[%s1338_s17 + %s3518_s16]]  ;;  %s2935_s10 = int_to_ptr.vmem [resolvable:$true] %s491_s10 }
 0x17d   : > { %s1788_s24 = scalar_lea.hbm %s466_s27, 16  ;;  %p1793_p1 = scmp.lt.u32.totalorder %s466_s27, %s3429_s1 }
 0x17e   : > { %p1789_p12 = scmp.ne.s32.totalorder %s466_s27, %s1788_s24  ;;  %p1794_p8 = scmp.lt.u32.totalorder %s2608_s20, %s1788_s24 }
 0x17f   : > { %p1796_p2 = scmp.lt.u32.totalorder %s1788_s24, %s466_s27 }
 0x180   : > { %p1790_p5 = pnand %p1789_p12, %p1362_p13  ;;  %p1795_p10 = por %p1794_p8, %p1793_p1 }
 0x182   : > { %p1791_p7 = pneg %p1790_p5  ;;  %p1797_p9 = por %p1796_p2, %p1795_p10 }
 0x184   : > { %p1798_p4 = pnand %p1797_p9, %p1791_p7 }
 0x186   : > { %1801 = shalt.err (!%p1798_p4)  }
 0x187   : > { %s1802_s4 = scalar_lea.vmem %s476_s2, 16  ;;  %p1809_p3 = scmp.lt.s32.totalorder %s476_s2, %s2587_s28 }
 0x188   : > { %p1803_p0 = scmp.ne.s32.totalorder %s476_s2, %s1802_s4  ;;  %p1810_p12 = scmp.lt.s32.totalorder %s2619_s13, %s1802_s4 }
 0x18a   : > { %p1804_p6 = pnand %p1803_p0, %p1362_p13  ;;  %p1811_p5 = por %p1810_p12, %p1809_p3 }
 0x18c   : > { %p1805_p11 = pneg %p1804_p6 }
 0x18e   : > { %p1812_p1 = pnand %p1811_p5, %p1805_p11 }
 0x190   : > { %1815 = shalt.err (!%p1812_p1)  }
 0x191   : > { %1337 = dma.hbm_to_vmem [thread:$0]  (%p1362_p13), %s466_s27, 16, %s476_s2, [#allocation3] }
 0x192   : > { %s495_s16 = sadd.s32 13, %s2574_s12  ;;  %s511_s18 = sadd.s32 14, %s2574_s12 }
 0x193   : > { %s1341_s25 = scalar_select %p1362_p13, [#allocation5], [#allocation89] }
 0x194   : > { %s3520_s16 = smov (!%p1362_p13, %s495_s16), 0  ;;  %s1248_s17 = sshll.u32 %s2921_s11, 4 }
 0x195   : > { %s2944_s29 = sld [smem:[%s1341_s25 + %s3520_s16]]  ;;  %s482_s9 = scalar_lea.hbm %s3429_s1, %s1248_s17 }
 0x196   : > { %s2417_s24 = smov [#allocation2 + $0xd]   ;;  %s1816_s26 = scalar_lea.hbm %s482_s9, 16 }
 0x197   : > { %s507_s14 = sshll.u32 %s2417_s24, 4  ;;  %p1817_p7 = scmp.ne.s32.totalorder %s482_s9, %s1816_s26  ;;  %s508_s14 = int_to_ptr.vmem [resolvable:$true] %s507_s14 }
 0x198   : > { %p1821_p2 = scmp.lt.u32.totalorder %s482_s9, %s3429_s1  ;;  %p1822_p9 = scmp.lt.u32.totalorder %s2608_s20, %s1816_s26 }
 0x199   : > { %p1818_p8 = pnand %p1817_p7, %p1362_p13  ;;  %p1824_p0 = scmp.lt.u32.totalorder %s1816_s26, %s482_s9 }
 0x19a   : > { %p1823_p4 = por %p1822_p9, %p1821_p2 }
 0x19b   : > { %p1819_p10 = pneg %p1818_p8 }
 0x19c   : > { %p1825_p6 = por %p1824_p0, %p1823_p4 }
 0x19e   : > { %p1826_p11 = pnand %p1825_p6, %p1819_p10 }
 0x1a0   : > { %1829 = shalt.err (!%p1826_p11)  }
 0x1a1   : > { %s1830_s11 = scalar_lea.vmem %s2935_s10, 16  ;;  %p1837_p1 = scmp.lt.s32.totalorder %s2935_s10, %s2587_s28 }
 0x1a2   : > { %p1831_p3 = scmp.ne.s32.totalorder %s2935_s10, %s1830_s11  ;;  %p1838_p7 = scmp.lt.s32.totalorder %s2619_s13, %s1830_s11 }
 0x1a4   : > { %p1832_p12 = pnand %p1831_p3, %p1362_p13  ;;  %p1839_p8 = por %p1838_p7, %p1837_p1 }
 0x1a6   : > { %p1833_p5 = pneg %p1832_p12 }
 0x1a8   : > { %p1840_p2 = pnand %p1839_p8, %p1833_p5 }
 0x1aa   : > { %1843 = shalt.err (!%p1840_p2)  }
 0x1ab   : > { %1340 = dma.hbm_to_vmem [thread:$0]  (%p1362_p13), %s482_s9, 16, %s2935_s10, [#allocation3] }
 0x1ac   : > { %s1344_s4 = scalar_select %p1362_p13, [#allocation5], [#allocation90] }
 0x1ad   : > { %s3522_s18 = smov (!%p1362_p13, %s511_s18), 0  ;;  %s1249_s16 = sshll.u32 %s2944_s29, 4 }
 0x1ae   : > { %s2418_s25 = smov [#allocation2 + $0xe]   ;;  %s498_s24 = scalar_lea.hbm %s3429_s1, %s1249_s16 }
 0x1af   : > { %s523_s17 = sshll.u32 %s2418_s25, 4  ;;  %s2973_s26 = sld [smem:[%s1344_s4 + %s3522_s18]]  ;;  %s2987_s17 = int_to_ptr.vmem [resolvable:$true] %s523_s17 }
 0x1b0   : > { %s1844_s2 = scalar_lea.hbm %s498_s24, 16  ;;  %p1849_p0 = scmp.lt.u32.totalorder %s498_s24, %s3429_s1 }
 0x1b1   : > { %p1845_p10 = scmp.ne.s32.totalorder %s498_s24, %s1844_s2  ;;  %p1850_p6 = scmp.lt.u32.totalorder %s2608_s20, %s1844_s2 }
 0x1b2   : > { %p1852_p3 = scmp.lt.u32.totalorder %s1844_s2, %s498_s24 }
 0x1b3   : > { %p1846_p9 = pnand %p1845_p10, %p1362_p13  ;;  %p1851_p11 = por %p1850_p6, %p1849_p0 }
 0x1b5   : > { %p1847_p4 = pneg %p1846_p9  ;;  %p1853_p12 = por %p1852_p3, %p1851_p11 }
 0x1b7   : > { %p1854_p5 = pnand %p1853_p12, %p1847_p4 }
 0x1b9   : > { %1857 = shalt.err (!%p1854_p5)  }
 0x1ba   : > { %s1858_s29 = scalar_lea.vmem %s508_s14, 16  ;;  %p1865_p2 = scmp.lt.s32.totalorder %s508_s14, %s2587_s28 }
 0x1bb   : > { %p1859_p1 = scmp.ne.s32.totalorder %s508_s14, %s1858_s29  ;;  %p1866_p10 = scmp.lt.s32.totalorder %s2619_s13, %s1858_s29 }
 0x1bd   : > { %p1860_p7 = pnand %p1859_p1, %p1362_p13  ;;  %p1867_p9 = por %p1866_p10, %p1865_p2 }
 0x1bf   : > { %p1861_p8 = pneg %p1860_p7 }
 0x1c1   : > { %p1868_p0 = pnand %p1867_p9, %p1861_p8 }
 0x1c3   : > { %1871 = shalt.err (!%p1868_p0)  }
 0x1c4   : > { %1343 = dma.hbm_to_vmem [thread:$0]  (%p1362_p13), %s498_s24, 16, %s508_s14, [#allocation3] }
 0x1c5   : > { %s527_s18 = sadd.s32 15, %s2574_s12  ;;  %s2995_s11 = sadd.s32 1, %s2390_s8 }
 0x1c6   : > { %s1347_s27 = scalar_select %p1362_p13, [#allocation5], [#allocation91] }
 0x1c7   : > { %s3524_s18 = smov (!%p1362_p13, %s527_s18), 0  ;;  %s1250_s4 = sshll.u32 %s2973_s26, 4 }
 0x1c8   : > { %s528_s16 = sld [smem:[%s1347_s27 + %s3524_s18]]  ;;  %s514_s23 = scalar_lea.hbm %s3429_s1, %s1250_s4 }
 0x1c9   : > { %s2419_s2 = smov [#allocation2 + $0xf]   ;;  %s1872_s9 = scalar_lea.hbm %s514_s23, 16 }
 0x1ca   : > { %s539_s10 = sshll.u32 %s2419_s2, 4  ;;  %p1873_p4 = scmp.ne.s32.totalorder %s514_s23, %s1872_s9  ;;  %s540_s10 = int_to_ptr.vmem [resolvable:$true] %s539_s10 }
 0x1cb   : > { %p1877_p3 = scmp.lt.u32.totalorder %s514_s23, %s3429_s1  ;;  %p1878_p12 = scmp.lt.u32.totalorder %s2608_s20, %s1872_s9 }
 0x1cc   : > { %p1874_p6 = pnand %p1873_p4, %p1362_p13  ;;  %p1880_p1 = scmp.lt.u32.totalorder %s1872_s9, %s514_s23 }
 0x1cd   : > { %p1879_p5 = por %p1878_p12, %p1877_p3 }
 0x1ce   : > { %p1875_p11 = pneg %p1874_p6 }
 0x1cf   : > { %p1881_p7 = por %p1880_p1, %p1879_p5 }
 0x1d1   : > { %p1882_p8 = pnand %p1881_p7, %p1875_p11 }
 0x1d3   : > { %1885 = shalt.err (!%p1882_p8)  }
 0x1d4   : > { %s1886_s24 = scalar_lea.vmem %s2987_s17, 16  ;;  %p1893_p0 = scmp.lt.s32.totalorder %s2987_s17, %s2587_s28 }
 0x1d5   : > { %p1887_p2 = scmp.ne.s32.totalorder %s2987_s17, %s1886_s24  ;;  %p1894_p4 = scmp.lt.s32.totalorder %s2619_s13, %s1886_s24 }
 0x1d7   : > { %p1888_p10 = pnand %p1887_p2, %p1362_p13  ;;  %p1895_p6 = por %p1894_p4, %p1893_p0 }
 0x1d9   : > { %p1889_p9 = pneg %p1888_p10 }
 0x1db   : > { %p1896_p3 = pnand %p1895_p6, %p1889_p9 }
 0x1dd   : > { %1899 = shalt.err (!%p1896_p3)  }
 0x1de   : > { %1346 = dma.hbm_to_vmem [thread:$0]  (%p1362_p13), %s514_s23, 16, %s2987_s17, [#allocation3] }
 0x1df   : > { %s1251_s26 = sshll.u32 %s528_s16, 4 }
 0x1e0   : > { %s530_s27 = scalar_lea.hbm %s3429_s1, %s1251_s26 }
 0x1e1   : > { %s1900_s4 = scalar_lea.hbm %s530_s27, 16  ;;  %p1905_p1 = scmp.lt.u32.totalorder %s530_s27, %s3429_s1 }
 0x1e2   : > { %p1901_p11 = scmp.ne.s32.totalorder %s530_s27, %s1900_s4  ;;  %p1906_p7 = scmp.lt.u32.totalorder %s2608_s20, %s1900_s4 }
 0x1e3   : > { %p1908_p2 = scmp.lt.u32.totalorder %s1900_s4, %s530_s27 }
 0x1e4   : > { %p1902_p12 = pnand %p1901_p11, %p1362_p13  ;;  %p1907_p8 = por %p1906_p7, %p1905_p1 }
 0x1e6   : > { %p1903_p5 = pneg %p1902_p12  ;;  %p1909_p10 = por %p1908_p2, %p1907_p8 }
 0x1e8   : > { %p1910_p9 = pnand %p1909_p10, %p1903_p5 }
 0x1ea   : > { %1913 = shalt.err (!%p1910_p9)  }
 0x1eb   : > { %s1914_s17 = scalar_lea.vmem %s540_s10, 16  ;;  %p1921_p3 = scmp.lt.s32.totalorder %s540_s10, %s2587_s28 }
 0x1ec   : > { %p1915_p0 = scmp.ne.s32.totalorder %s540_s10, %s1914_s17  ;;  %p1922_p11 = scmp.lt.s32.totalorder %s2619_s13, %s1914_s17 }
 0x1ee   : > { %p1916_p4 = pnand %p1915_p0, %p1362_p13  ;;  %p1923_p12 = por %p1922_p11, %p1921_p3 }
 0x1f0   : > { %p1917_p6 = pneg %p1916_p4 }
 0x1f2   : > { %p1924_p1 = pnand %p1923_p12, %p1917_p6 }
 0x1f4   : > { %1927 = shalt.err (!%p1924_p1)  }
 0x1f5   : > { %1349 = dma.hbm_to_vmem [thread:$0]  (%p1362_p13), %s530_s27, 16, %s540_s10, [#allocation3] }
 0x1f6   : > { %s3033_s16 = scalar_lea.vmem [#allocation9], %s2567_s19  ;;  %p1252_p5 = scmp.ge.s32.totalorder %s2995_s11, 2 }
 0x1f7   : > { %3475 = sst [smem:[#allocation105_spill]] %s3033_s16  ;;  %p549_p7 = scmp.eq.s32.totalorder (!%p1252_p5), %s2995_s11, 2 }
 0x1f8   : > { %547 = sbr.rel (%p1252_p5) target bundleno = 872 (0x368), region = 116  ;;  %s554_s23 = ssub.s32 (!%p1252_p5), 1, %s2570_s22 }
 0x1f9   : > { %s1254_s2 = sshll.u32 (!%p1252_p5), %s554_s23, 4 }
 0x1fa   : > { %s3039_s14 = scalar_lea.vmem (!%p1252_p5), [#allocation2], %s1254_s2 }
 0x1fb   : > { %s569_s10 = sshll.u32 (!%p1252_p5), %s3039_s14, 4  ;;  %s1108_s25 = scalar_lea.vmem (!%p1252_p5), %s3039_s14, 2 [#allocation2]  ;;  %s3044_s10 = int_to_ptr.vmem [resolvable:$true] %s569_s10 }
 0x1fc   : > { %s603_s17 = sshll.u32 (!%p1252_p5), %s1108_s25, 4  ;;  %s3060_s17 = int_to_ptr.vmem [resolvable:$true] %s603_s17 }
 0x1ff   : > { %s3526_s11 = smov (%p549_p7, %s2995_s11), 0 }
 0x200   : > { %s552_s9 = scalar_select %p549_p7, 1, 0 }
 0x202   : > { %s553_s12 = sadd.s32 %s552_s9, %s3526_s11  ;;  %s1103_s11 = scalar_lea.vmem %s3039_s14, 1 [#allocation2] }
 0x203   : > { %s3042_s19 = sshll.u32 %s553_s12, 4  ;;  %s586_s18 = sshll.u32 %s1103_s11, 4  ;;  %s3052_s18 = int_to_ptr.vmem [resolvable:$true] %s586_s18 }
 0x204   : > { %s557_s24 = sld [smem:[#allocation5 + %s3042_s19]]  ;;  %s573_s26 = sadd.s32 1, %s3042_s19 }
 0x205   : > { %s3048_s29 = sld [smem:[#allocation5 + %s573_s26]]  ;;  %s590_s27 = sadd.s32 2, %s3042_s19 }
 0x206   : > { %s3054_s4 = sld [smem:[#allocation5 + %s590_s27]]  ;;  %s607_s0 = sadd.s32 3, %s3042_s19 }
 0x207   : > { %s3058_s2 = sld [smem:[#allocation5 + %s607_s0]]  ;;  %s3066_s11 = scalar_lea.sflag [#allocation3], %s554_s23 }
 0x20a   : > { %s1255_s9 = sshll.u32 %s557_s24, 4 }
 0x20b   : > { %s559_s7 = scalar_lea.hbm %s3429_s1, %s1255_s9  ;;  %s1256_s15 = sshll.u32 %s3048_s29, 4 }
 0x20c   : > { %s1928_s30 = scalar_lea.hbm %s559_s7, 16  ;;  %p1931_p8 = scmp.lt.u32.totalorder %s559_s7, %s3429_s1 }
 0x20d   : > { %p1929_p13 = scmp.ne.s32.totalorder %s559_s7, %s1928_s30  ;;  %p1932_p2 = scmp.lt.u32.totalorder %s2608_s20, %s1928_s30 }
 0x20e   : > { %p1934_p9 = scmp.lt.u32.totalorder %s1928_s30, %s559_s7 }
 0x20f   : > { %p1933_p10 = por %p1932_p2, %p1931_p8 }
 0x211   : > { %p1935_p0 = por %p1934_p9, %p1933_p10 }
 0x213   : > { %p1936_p4 = pnand %p1935_p0, %p1929_p13 }
 0x215   : > { %1939 = shalt.err (!%p1936_p4)  }
 0x216   : > { %s1940_s24 = scalar_lea.vmem %s3044_s10, 16  ;;  %p1945_p3 = scmp.lt.s32.totalorder %s3044_s10, %s2587_s28 }
 0x217   : > { %p1941_p6 = scmp.ne.s32.totalorder %s3044_s10, %s1940_s24  ;;  %p1946_p11 = scmp.lt.s32.totalorder %s2619_s13, %s1940_s24 }
 0x219   : > { %p1947_p12 = por %p1946_p11, %p1945_p3 }
 0x21b   : > { %p1948_p1 = pnand %p1947_p12, %p1941_p6 }
 0x21d   : > { %1951 = shalt.err (!%p1948_p1)  }
 0x21e   : > { %572 = dma.hbm_to_vmem [thread:$0]  %s559_s7, 16, %s3044_s10, %s3066_s11 }
 0x21f   : > { %s577_s23 = scalar_lea.hbm %s3429_s1, %s1256_s15  ;;  %s1258_s29 = sshll.u32 %s3054_s4, 4 }
 0x220   : > { %s1952_s25 = scalar_lea.hbm %s577_s23, 16  ;;  %p1955_p7 = scmp.lt.u32.totalorder %s577_s23, %s3429_s1 }
 0x221   : > { %p1953_p5 = scmp.ne.s32.totalorder %s577_s23, %s1952_s25  ;;  %p1956_p13 = scmp.lt.u32.totalorder %s2608_s20, %s1952_s25 }
 0x222   : > { %p1958_p2 = scmp.lt.u32.totalorder %s1952_s25, %s577_s23 }
 0x223   : > { %p1957_p8 = por %p1956_p13, %p1955_p7 }
 0x225   : > { %p1959_p10 = por %p1958_p2, %p1957_p8 }
 0x227   : > { %p1960_p9 = pnand %p1959_p10, %p1953_p5 }
 0x229   : > { %1963 = shalt.err (!%p1960_p9)  }
 0x22a   : > { %s1964_s7 = scalar_lea.vmem %s3052_s18, 16  ;;  %p1969_p4 = scmp.lt.s32.totalorder %s3052_s18, %s2587_s28 }
 0x22b   : > { %p1965_p0 = scmp.ne.s32.totalorder %s3052_s18, %s1964_s7  ;;  %p1970_p6 = scmp.lt.s32.totalorder %s2619_s13, %s1964_s7 }
 0x22d   : > { %p1971_p3 = por %p1970_p6, %p1969_p4 }
 0x22f   : > { %p1972_p11 = pnand %p1971_p3, %p1965_p0 }
 0x231   : > { %1975 = shalt.err (!%p1972_p11)  }
 0x232   : > { %589 = dma.hbm_to_vmem [thread:$0]  %s577_s23, 16, %s3052_s18, %s3066_s11 }
 0x233   : > { %s594_s4 = scalar_lea.hbm %s3429_s1, %s1258_s29  ;;  %s1260_s12 = sshll.u32 %s3058_s2, 4 }
 0x234   : > { %s1976_s26 = scalar_lea.hbm %s594_s4, 16  ;;  %p1979_p1 = scmp.lt.u32.totalorder %s594_s4, %s3429_s1 }
 0x235   : > { %p1977_p12 = scmp.ne.s32.totalorder %s594_s4, %s1976_s26  ;;  %p1980_p5 = scmp.lt.u32.totalorder %s2608_s20, %s1976_s26 }
 0x236   : > { %p1982_p13 = scmp.lt.u32.totalorder %s1976_s26, %s594_s4 }
 0x237   : > { %p1981_p7 = por %p1980_p5, %p1979_p1 }
 0x239   : > { %p1983_p8 = por %p1982_p13, %p1981_p7 }
 0x23b   : > { %p1984_p2 = pnand %p1983_p8, %p1977_p12 }
 0x23d   : > { %1987 = shalt.err (!%p1984_p2)  }
 0x23e   : > { %s1988_s18 = scalar_lea.vmem %s3060_s17, 16  ;;  %p1993_p9 = scmp.lt.s32.totalorder %s3060_s17, %s2587_s28 }
 0x23f   : > { %p1989_p10 = scmp.ne.s32.totalorder %s3060_s17, %s1988_s18  ;;  %p1994_p0 = scmp.lt.s32.totalorder %s2619_s13, %s1988_s18 }
 0x241   : > { %p1995_p4 = por %p1994_p0, %p1993_p9 }
 0x243   : > { %p1996_p6 = pnand %p1995_p4, %p1989_p10 }
 0x245   : > { %1999 = shalt.err (!%p1996_p6)  }
 0x246   : > { %606 = dma.hbm_to_vmem [thread:$0]  %s594_s4, 16, %s3060_s17, %s3066_s11 }
 0x247   : > { %s611_s16 = scalar_lea.hbm %s3429_s1, %s1260_s12  ;;  %s1113_s23 = scalar_lea.vmem %s3039_s14, 3 [#allocation2] }
 0x248   : > { %s620_s29 = sshll.u32 %s1113_s23, 4  ;;  %s624_s25 = sadd.s32 4, %s3042_s19  ;;  %s621_s29 = int_to_ptr.vmem [resolvable:$true] %s620_s29 }
 0x249   : > { %s3114_s0 = sld [smem:[#allocation5 + %s624_s25]]  ;;  %s2000_s9 = scalar_lea.hbm %s611_s16, 16 }
 0x24a   : > { %p2001_p3 = scmp.ne.s32.totalorder %s611_s16, %s2000_s9  ;;  %p2003_p11 = scmp.lt.u32.totalorder %s611_s16, %s3429_s1 }
 0x24b   : > { %p2004_p12 = scmp.lt.u32.totalorder %s2608_s20, %s2000_s9  ;;  %p2006_p5 = scmp.lt.u32.totalorder %s2000_s9, %s611_s16 }
 0x24d   : > { %p2005_p1 = por %p2004_p12, %p2003_p11 }
 0x24f   : > { %p2007_p7 = por %p2006_p5, %p2005_p1 }
 0x251   : > { %p2008_p13 = pnand %p2007_p7, %p2001_p3 }
 0x253   : > { %2011 = shalt.err (!%p2008_p13)  }
 0x254   : > { %s2012_s17 = scalar_lea.vmem %s621_s29, 16  ;;  %p2017_p2 = scmp.lt.s32.totalorder %s621_s29, %s2587_s28 }
 0x255   : > { %p2013_p8 = scmp.ne.s32.totalorder %s621_s29, %s2012_s17  ;;  %p2018_p10 = scmp.lt.s32.totalorder %s2619_s13, %s2012_s17 }
 0x257   : > { %p2019_p9 = por %p2018_p10, %p2017_p2 }
 0x259   : > { %p2020_p0 = pnand %p2019_p9, %p2013_p8 }
 0x25b   : > { %2023 = shalt.err (!%p2020_p0)  }
 0x25c   : > { %623 = dma.hbm_to_vmem [thread:$0]  %s611_s16, 16, %s621_s29, %s3066_s11 }
 0x25d   : > { %s1118_s10 = scalar_lea.vmem %s3039_s14, 4 [#allocation2]  ;;  %s641_s4 = sadd.s32 5, %s3042_s19 }
 0x25e   : > { %s637_s12 = sshll.u32 %s1118_s10, 4  ;;  %s3125_s26 = sld [smem:[#allocation5 + %s641_s4]]  ;;  %s638_s12 = int_to_ptr.vmem [resolvable:$true] %s637_s12 }
 0x25f   : > { %s1123_s27 = scalar_lea.vmem %s3039_s14, 5 [#allocation2]  ;;  %s658_s18 = sadd.s32 6, %s3042_s19 }
 0x260   : > { %s654_s24 = sshll.u32 %s1123_s27, 4  ;;  %s1262_s2 = sshll.u32 %s3114_s0, 4  ;;  %s3130_s24 = int_to_ptr.vmem [resolvable:$true] %s654_s24 }
 0x261   : > { %s628_s25 = scalar_lea.hbm %s3429_s1, %s1262_s2  ;;  %s3135_s9 = sld [smem:[#allocation5 + %s658_s18]] }
 0x262   : > { %s2024_s16 = scalar_lea.hbm %s628_s25, 16  ;;  %p2027_p6 = scmp.lt.u32.totalorder %s628_s25, %s3429_s1 }
 0x263   : > { %p2025_p4 = scmp.ne.s32.totalorder %s628_s25, %s2024_s16  ;;  %p2028_p3 = scmp.lt.u32.totalorder %s2608_s20, %s2024_s16 }
 0x264   : > { %p2030_p12 = scmp.lt.u32.totalorder %s2024_s16, %s628_s25 }
 0x265   : > { %p2029_p11 = por %p2028_p3, %p2027_p6 }
 0x267   : > { %p2031_p1 = por %p2030_p12, %p2029_p11 }
 0x269   : > { %p2032_p5 = pnand %p2031_p1, %p2025_p4 }
 0x26b   : > { %2035 = shalt.err (!%p2032_p5)  }
 0x26c   : > { %s2036_s0 = scalar_lea.vmem %s638_s12, 16  ;;  %p2041_p13 = scmp.lt.s32.totalorder %s638_s12, %s2587_s28 }
 0x26d   : > { %p2037_p7 = scmp.ne.s32.totalorder %s638_s12, %s2036_s0  ;;  %p2042_p8 = scmp.lt.s32.totalorder %s2619_s13, %s2036_s0 }
 0x26f   : > { %p2043_p2 = por %p2042_p8, %p2041_p13 }
 0x271   : > { %p2044_p10 = pnand %p2043_p2, %p2037_p7 }
 0x273   : > { %2047 = shalt.err (!%p2044_p10)  }
 0x274   : > { %640 = dma.hbm_to_vmem [thread:$0]  %s628_s25, 16, %s638_s12, %s3066_s11 }
 0x275   : > { %s1264_s15 = sshll.u32 %s3125_s26, 4  ;;  %s1128_s17 = scalar_lea.vmem %s3039_s14, 6 [#allocation2] }
 0x276   : > { %s645_s27 = scalar_lea.hbm %s3429_s1, %s1264_s15  ;;  %s671_s18 = sshll.u32 %s1128_s17, 4  ;;  %s672_s18 = int_to_ptr.vmem [resolvable:$true] %s671_s18 }
 0x277   : > { %s2048_s2 = scalar_lea.hbm %s645_s27, 16  ;;  %p2051_p0 = scmp.lt.u32.totalorder %s645_s27, %s3429_s1 }
 0x278   : > { %p2049_p9 = scmp.ne.s32.totalorder %s645_s27, %s2048_s2  ;;  %p2052_p4 = scmp.lt.u32.totalorder %s2608_s20, %s2048_s2 }
 0x279   : > { %p2054_p3 = scmp.lt.u32.totalorder %s2048_s2, %s645_s27 }
 0x27a   : > { %p2053_p6 = por %p2052_p4, %p2051_p0 }
 0x27c   : > { %p2055_p11 = por %p2054_p3, %p2053_p6 }
 0x27e   : > { %p2056_p12 = pnand %p2055_p11, %p2049_p9 }
 0x280   : > { %2059 = shalt.err (!%p2056_p12)  }
 0x281   : > { %s2060_s12 = scalar_lea.vmem %s3130_s24, 16  ;;  %p2065_p5 = scmp.lt.s32.totalorder %s3130_s24, %s2587_s28 }
 0x282   : > { %p2061_p1 = scmp.ne.s32.totalorder %s3130_s24, %s2060_s12  ;;  %p2066_p7 = scmp.lt.s32.totalorder %s2619_s13, %s2060_s12 }
 0x284   : > { %p2067_p13 = por %p2066_p7, %p2065_p5 }
 0x286   : > { %p2068_p8 = pnand %p2067_p13, %p2061_p1 }
 0x288   : > { %2071 = shalt.err (!%p2068_p8)  }
 0x289   : > { %657 = dma.hbm_to_vmem [thread:$0]  %s645_s27, 16, %s3130_s24, %s3066_s11 }
 0x28a   : > { %s675_s26 = sadd.s32 7, %s3042_s19  ;;  %s1266_s25 = sshll.u32 %s3135_s9, 4 }
 0x28b   : > { %s3162_s16 = sld [smem:[#allocation5 + %s675_s26]]  ;;  %s662_s0 = scalar_lea.hbm %s3429_s1, %s1266_s25 }
 0x28c   : > { %s1133_s15 = scalar_lea.vmem %s3039_s14, 7 [#allocation2]  ;;  %s2072_s17 = scalar_lea.hbm %s662_s0, 16 }
 0x28d   : > { %p2073_p2 = scmp.ne.s32.totalorder %s662_s0, %s2072_s17  ;;  %p2075_p10 = scmp.lt.u32.totalorder %s662_s0, %s3429_s1 }
 0x28e   : > { %p2076_p9 = scmp.lt.u32.totalorder %s2608_s20, %s2072_s17  ;;  %p2078_p4 = scmp.lt.u32.totalorder %s2072_s17, %s662_s0 }
 0x290   : > { %p2077_p0 = por %p2076_p9, %p2075_p10 }
 0x292   : > { %p2079_p6 = por %p2078_p4, %p2077_p0 }
 0x294   : > { %p2080_p3 = pnand %p2079_p6, %p2073_p2 }
 0x296   : > { %2083 = shalt.err (!%p2080_p3)  }
 0x297   : > { %s2084_s24 = scalar_lea.vmem %s672_s18, 16  ;;  %p2089_p12 = scmp.lt.s32.totalorder %s672_s18, %s2587_s28 }
 0x298   : > { %p2085_p11 = scmp.ne.s32.totalorder %s672_s18, %s2084_s24  ;;  %p2090_p1 = scmp.lt.s32.totalorder %s2619_s13, %s2084_s24 }
 0x29a   : > { %p2091_p5 = por %p2090_p1, %p2089_p12 }
 0x29c   : > { %p2092_p7 = pnand %p2091_p5, %p2085_p11 }
 0x29e   : > { %2095 = shalt.err (!%p2092_p7)  }
 0x29f   : > { %674 = dma.hbm_to_vmem [thread:$0]  %s662_s0, 16, %s672_s18, %s3066_s11 }
 0x2a0   : > { %s688_s9 = sshll.u32 %s1133_s15, 4  ;;  %s692_s27 = sadd.s32 8, %s3042_s19  ;;  %s689_s9 = int_to_ptr.vmem [resolvable:$true] %s688_s9 }
 0x2a1   : > { %s3176_s2 = sld [smem:[#allocation5 + %s692_s27]]  ;;  %s1138_s30 = scalar_lea.vmem %s3039_s14, 8 [#allocation2] }
 0x2a2   : > { %s709_s23 = sadd.s32 9, %s3042_s19  ;;  %s1268_s12 = sshll.u32 %s3162_s16, 4 }
 0x2a3   : > { %s705_s26 = sshll.u32 %s1138_s30, 4  ;;  %s679_s7 = scalar_lea.hbm %s3429_s1, %s1268_s12  ;;  %s3184_s26 = int_to_ptr.vmem [resolvable:$true] %s705_s26 }
 0x2a4   : > { %s2096_s17 = scalar_lea.hbm %s679_s7, 16  ;;  %p2099_p8 = scmp.lt.u32.totalorder %s679_s7, %s3429_s1 }
 0x2a5   : > { %p2097_p13 = scmp.ne.s32.totalorder %s679_s7, %s2096_s17  ;;  %p2100_p2 = scmp.lt.u32.totalorder %s2608_s20, %s2096_s17 }
 0x2a6   : > { %p2102_p9 = scmp.lt.u32.totalorder %s2096_s17, %s679_s7 }
 0x2a7   : > { %p2101_p10 = por %p2100_p2, %p2099_p8 }
 0x2a9   : > { %p2103_p0 = por %p2102_p9, %p2101_p10 }
 0x2ab   : > { %p2104_p4 = pnand %p2103_p0, %p2097_p13 }
 0x2ad   : > { %2107 = shalt.err (!%p2104_p4)  }
 0x2ae   : > { %s2108_s18 = scalar_lea.vmem %s689_s9, 16  ;;  %p2113_p3 = scmp.lt.s32.totalorder %s689_s9, %s2587_s28 }
 0x2af   : > { %p2109_p6 = scmp.ne.s32.totalorder %s689_s9, %s2108_s18  ;;  %p2114_p11 = scmp.lt.s32.totalorder %s2619_s13, %s2108_s18 }
 0x2b1   : > { %p2115_p12 = por %p2114_p11, %p2113_p3 }
 0x2b3   : > { %p2116_p1 = pnand %p2115_p12, %p2109_p6 }
 0x2b5   : > { %2119 = shalt.err (!%p2116_p1)  }
 0x2b6   : > { %691 = dma.hbm_to_vmem [thread:$0]  %s679_s7, 16, %s689_s9, %s3066_s11 }
 0x2b7   : > { %s3193_s16 = sld [smem:[#allocation5 + %s709_s23]]  ;;  %s1143_s0 = scalar_lea.vmem %s3039_s14, 9 [#allocation2] }
 0x2b8   : > { %s1270_s15 = sshll.u32 %s3176_s2, 4  ;;  %s722_s24 = sshll.u32 %s1143_s0, 4  ;;  %s3200_s24 = int_to_ptr.vmem [resolvable:$true] %s722_s24 }
 0x2b9   : > { %s696_s12 = scalar_lea.hbm %s3429_s1, %s1270_s15 }
 0x2ba   : > { %s2120_s25 = scalar_lea.hbm %s696_s12, 16  ;;  %p2123_p7 = scmp.lt.u32.totalorder %s696_s12, %s3429_s1 }
 0x2bb   : > { %p2121_p5 = scmp.ne.s32.totalorder %s696_s12, %s2120_s25  ;;  %p2124_p13 = scmp.lt.u32.totalorder %s2608_s20, %s2120_s25 }
 0x2bc   : > { %p2126_p2 = scmp.lt.u32.totalorder %s2120_s25, %s696_s12 }
 0x2bd   : > { %p2125_p8 = por %p2124_p13, %p2123_p7 }
 0x2bf   : > { %p2127_p10 = por %p2126_p2, %p2125_p8 }
 0x2c1   : > { %p2128_p9 = pnand %p2127_p10, %p2121_p5 }
 0x2c3   : > { %2131 = shalt.err (!%p2128_p9)  }
 0x2c4   : > { %s2132_s9 = scalar_lea.vmem %s3184_s26, 16  ;;  %p2137_p4 = scmp.lt.s32.totalorder %s3184_s26, %s2587_s28 }
 0x2c5   : > { %p2133_p0 = scmp.ne.s32.totalorder %s3184_s26, %s2132_s9  ;;  %p2138_p6 = scmp.lt.s32.totalorder %s2619_s13, %s2132_s9 }
 0x2c7   : > { %p2139_p3 = por %p2138_p6, %p2137_p4 }
 0x2c9   : > { %p2140_p11 = pnand %p2139_p3, %p2133_p0 }
 0x2cb   : > { %2143 = shalt.err (!%p2140_p11)  }
 0x2cc   : > { %708 = dma.hbm_to_vmem [thread:$0]  %s696_s12, 16, %s3184_s26, %s3066_s11 }
 0x2cd   : > { %s726_s2 = sadd.s32 10, %s3042_s19  ;;  %s1148_s23 = scalar_lea.vmem %s3039_s14, 10 [#allocation2] }
 0x2ce   : > { %s3215_s7 = sld [smem:[#allocation5 + %s726_s2]]  ;;  %s739_s10 = sshll.u32 %s1148_s23, 4  ;;  %s3218_s10 = int_to_ptr.vmem [resolvable:$true] %s739_s10 }
 0x2cf   : > { %s1272_s4 = sshll.u32 %s3193_s16, 4  ;;  %s743_s27 = sadd.s32 11, %s3042_s19 }
 0x2d0   : > { %s713_s15 = scalar_lea.hbm %s3429_s1, %s1272_s4 }
 0x2d1   : > { %s2144_s30 = scalar_lea.hbm %s713_s15, 16  ;;  %p2147_p1 = scmp.lt.u32.totalorder %s713_s15, %s3429_s1 }
 0x2d2   : > { %p2145_p12 = scmp.ne.s32.totalorder %s713_s15, %s2144_s30  ;;  %p2148_p5 = scmp.lt.u32.totalorder %s2608_s20, %s2144_s30 }
 0x2d3   : > { %p2150_p13 = scmp.lt.u32.totalorder %s2144_s30, %s713_s15 }
 0x2d4   : > { %p2149_p7 = por %p2148_p5, %p2147_p1 }
 0x2d6   : > { %p2151_p8 = por %p2150_p13, %p2149_p7 }
 0x2d8   : > { %p2152_p2 = pnand %p2151_p8, %p2145_p12 }
 0x2da   : > { %2155 = shalt.err (!%p2152_p2)  }
 0x2db   : > { %s2156_s26 = scalar_lea.vmem %s3200_s24, 16  ;;  %p2161_p9 = scmp.lt.s32.totalorder %s3200_s24, %s2587_s28 }
 0x2dc   : > { %p2157_p10 = scmp.ne.s32.totalorder %s3200_s24, %s2156_s26  ;;  %p2162_p0 = scmp.lt.s32.totalorder %s2619_s13, %s2156_s26 }
 0x2de   : > { %p2163_p4 = por %p2162_p0, %p2161_p9 }
 0x2e0   : > { %p2164_p6 = pnand %p2163_p4, %p2157_p10 }
 0x2e2   : > { %2167 = shalt.err (!%p2164_p6)  }
 0x2e3   : > { %725 = dma.hbm_to_vmem [thread:$0]  %s713_s15, 16, %s3200_s24, %s3066_s11 }
 0x2e4   : > { %s3235_s16 = sld [smem:[#allocation5 + %s743_s27]]  ;;  %s1153_s12 = scalar_lea.vmem %s3039_s14, 11 [#allocation2] }
 0x2e5   : > { %s756_s17 = sshll.u32 %s1153_s12, 4  ;;  %s760_s9 = sadd.s32 12, %s3042_s19  ;;  %s3240_s17 = int_to_ptr.vmem [resolvable:$true] %s756_s17 }
 0x2e6   : > { %s1274_s2 = sshll.u32 %s3215_s7, 4  ;;  %s3245_s0 = sld [smem:[#allocation5 + %s760_s9]] }
 0x2e7   : > { %s730_s18 = scalar_lea.hbm %s3429_s1, %s1274_s2 }
 0x2e8   : > { %s2168_s30 = scalar_lea.hbm %s730_s18, 16  ;;  %p2171_p11 = scmp.lt.u32.totalorder %s730_s18, %s3429_s1 }
 0x2e9   : > { %p2169_p3 = scmp.ne.s32.totalorder %s730_s18, %s2168_s30  ;;  %p2172_p12 = scmp.lt.u32.totalorder %s2608_s20, %s2168_s30 }
 0x2ea   : > { %p2174_p5 = scmp.lt.u32.totalorder %s2168_s30, %s730_s18 }
 0x2eb   : > { %p2173_p1 = por %p2172_p12, %p2171_p11 }
 0x2ed   : > { %p2175_p7 = por %p2174_p5, %p2173_p1 }
 0x2ef   : > { %p2176_p13 = pnand %p2175_p7, %p2169_p3 }
 0x2f1   : > { %2179 = shalt.err (!%p2176_p13)  }
 0x2f2   : > { %s2180_s24 = scalar_lea.vmem %s3218_s10, 16  ;;  %p2185_p2 = scmp.lt.s32.totalorder %s3218_s10, %s2587_s28 }
 0x2f3   : > { %p2181_p8 = scmp.ne.s32.totalorder %s3218_s10, %s2180_s24  ;;  %p2186_p10 = scmp.lt.s32.totalorder %s2619_s13, %s2180_s24 }
 0x2f5   : > { %p2187_p9 = por %p2186_p10, %p2185_p2 }
 0x2f7   : > { %p2188_p0 = pnand %p2187_p9, %p2181_p8 }
 0x2f9   : > { %2191 = shalt.err (!%p2188_p0)  }
 0x2fa   : > { %742 = dma.hbm_to_vmem [thread:$0]  %s730_s18, 16, %s3218_s10, %s3066_s11 }
 0x2fb   : > { %s1158_s7 = scalar_lea.vmem %s3039_s14, 12 [#allocation2]  ;;  %s777_s15 = sadd.s32 13, %s3042_s19 }
 0x2fc   : > { %s1276_s27 = sshll.u32 %s3235_s16, 4  ;;  %s773_s26 = sshll.u32 %s1158_s7, 4  ;;  %s3264_s26 = int_to_ptr.vmem [resolvable:$true] %s773_s26 }
 0x2fd   : > { %s747_s2 = scalar_lea.hbm %s3429_s1, %s1276_s27 }
 0x2fe   : > { %s2192_s23 = scalar_lea.hbm %s747_s2, 16  ;;  %p2195_p6 = scmp.lt.u32.totalorder %s747_s2, %s3429_s1 }
 0x2ff   : > { %p2193_p4 = scmp.ne.s32.totalorder %s747_s2, %s2192_s23  ;;  %p2196_p3 = scmp.lt.u32.totalorder %s2608_s20, %s2192_s23 }
 0x300   : > { %p2198_p12 = scmp.lt.u32.totalorder %s2192_s23, %s747_s2 }
 0x301   : > { %p2197_p11 = por %p2196_p3, %p2195_p6 }
 0x303   : > { %p2199_p1 = por %p2198_p12, %p2197_p11 }
 0x305   : > { %p2200_p5 = pnand %p2199_p1, %p2193_p4 }
 0x307   : > { %2203 = shalt.err (!%p2200_p5)  }
 0x308   : > { %s2204_s10 = scalar_lea.vmem %s3240_s17, 16  ;;  %p2209_p13 = scmp.lt.s32.totalorder %s3240_s17, %s2587_s28 }
 0x309   : > { %p2205_p7 = scmp.ne.s32.totalorder %s3240_s17, %s2204_s10  ;;  %p2210_p8 = scmp.lt.s32.totalorder %s2619_s13, %s2204_s10 }
 0x30b   : > { %p2211_p2 = por %p2210_p8, %p2209_p13 }
 0x30d   : > { %p2212_p10 = pnand %p2211_p2, %p2205_p7 }
 0x30f   : > { %2215 = shalt.err (!%p2212_p10)  }
 0x310   : > { %759 = dma.hbm_to_vmem [thread:$0]  %s747_s2, 16, %s3240_s17, %s3066_s11 }
 0x311   : > { %s1278_s16 = sshll.u32 %s3245_s0, 4  ;;  %s3278_s18 = sld [smem:[#allocation5 + %s777_s15]] }
 0x312   : > { %s764_s24 = scalar_lea.hbm %s3429_s1, %s1278_s16  ;;  %s1163_s7 = scalar_lea.vmem %s3039_s14, 13 [#allocation2] }
 0x313   : > { %s2216_s27 = scalar_lea.hbm %s764_s24, 16  ;;  %p2219_p0 = scmp.lt.u32.totalorder %s764_s24, %s3429_s1 }
 0x314   : > { %p2217_p9 = scmp.ne.s32.totalorder %s764_s24, %s2216_s27  ;;  %p2220_p4 = scmp.lt.u32.totalorder %s2608_s20, %s2216_s27 }
 0x315   : > { %p2222_p3 = scmp.lt.u32.totalorder %s2216_s27, %s764_s24 }
 0x316   : > { %p2221_p6 = por %p2220_p4, %p2219_p0 }
 0x318   : > { %p2223_p11 = por %p2222_p3, %p2221_p6 }
 0x31a   : > { %p2224_p12 = pnand %p2223_p11, %p2217_p9 }
 0x31c   : > { %2227 = shalt.err (!%p2224_p12)  }
 0x31d   : > { %s2228_s17 = scalar_lea.vmem %s3264_s26, 16  ;;  %p2233_p5 = scmp.lt.s32.totalorder %s3264_s26, %s2587_s28 }
 0x31e   : > { %p2229_p1 = scmp.ne.s32.totalorder %s3264_s26, %s2228_s17  ;;  %p2234_p7 = scmp.lt.s32.totalorder %s2619_s13, %s2228_s17 }
 0x320   : > { %p2235_p13 = por %p2234_p7, %p2233_p5 }
 0x322   : > { %p2236_p8 = pnand %p2235_p13, %p2229_p1 }
 0x324   : > { %2239 = shalt.err (!%p2236_p8)  }
 0x325   : > { %776 = dma.hbm_to_vmem [thread:$0]  %s764_s24, 16, %s3264_s26, %s3066_s11 }
 0x326   : > { %s790_s0 = sshll.u32 %s1163_s7, 4  ;;  %s794_s15 = sadd.s32 14, %s3042_s19  ;;  %s791_s0 = int_to_ptr.vmem [resolvable:$true] %s790_s0 }
 0x327   : > { %s795_s2 = sld [smem:[#allocation5 + %s794_s15]]  ;;  %s1168_s23 = scalar_lea.vmem %s3039_s14, 14 [#allocation2] }
 0x328   : > { %s811_s4 = sadd.s32 15, %s3042_s19  ;;  %s1280_s30 = sshll.u32 %s3278_s18, 4 }
 0x329   : > { %s807_s10 = sshll.u32 %s1168_s23, 4  ;;  %s781_s29 = scalar_lea.hbm %s3429_s1, %s1280_s30  ;;  %s3302_s10 = int_to_ptr.vmem [resolvable:$true] %s807_s10 }
 0x32a   : > { %s2240_s27 = scalar_lea.hbm %s781_s29, 16  ;;  %p2243_p10 = scmp.lt.u32.totalorder %s781_s29, %s3429_s1 }
 0x32b   : > { %p2241_p2 = scmp.ne.s32.totalorder %s781_s29, %s2240_s27  ;;  %p2244_p9 = scmp.lt.u32.totalorder %s2608_s20, %s2240_s27 }
 0x32c   : > { %p2246_p4 = scmp.lt.u32.totalorder %s2240_s27, %s781_s29 }
 0x32d   : > { %p2245_p0 = por %p2244_p9, %p2243_p10 }
 0x32f   : > { %p2247_p6 = por %p2246_p4, %p2245_p0 }
 0x331   : > { %p2248_p3 = pnand %p2247_p6, %p2241_p2 }
 0x333   : > { %2251 = shalt.err (!%p2248_p3)  }
 0x334   : > { %s2252_s19 = scalar_lea.vmem %s791_s0, 16  ;;  %p2257_p12 = scmp.lt.s32.totalorder %s791_s0, %s2587_s28 }
 0x335   : > { %p2253_p11 = scmp.ne.s32.totalorder %s791_s0, %s2252_s19  ;;  %p2258_p1 = scmp.lt.s32.totalorder %s2619_s13, %s2252_s19 }
 0x337   : > { %p2259_p5 = por %p2258_p1, %p2257_p12 }
 0x339   : > { %p2260_p7 = pnand %p2259_p5, %p2253_p11 }
 0x33b   : > { %2263 = shalt.err (!%p2260_p7)  }
 0x33c   : > { %793 = dma.hbm_to_vmem [thread:$0]  %s781_s29, 16, %s791_s0, %s3066_s11 }
 0x33d   : > { %s812_s26 = sld [smem:[#allocation5 + %s811_s4]]  ;;  %s1173_s18 = scalar_lea.vmem %s3039_s14, 15 [#allocation2] }
 0x33e   : > { %s1282_s24 = sshll.u32 %s795_s2, 4  ;;  %s824_s23 = sshll.u32 %s1173_s18, 4  ;;  %s825_s23 = int_to_ptr.vmem [resolvable:$true] %s824_s23 }
 0x33f   : > { %s798_s15 = scalar_lea.hbm %s3429_s1, %s1282_s24 }
 0x340   : > { %s2264_s30 = scalar_lea.hbm %s798_s15, 16  ;;  %p2267_p8 = scmp.lt.u32.totalorder %s798_s15, %s3429_s1 }
 0x341   : > { %p2265_p13 = scmp.ne.s32.totalorder %s798_s15, %s2264_s30  ;;  %p2268_p2 = scmp.lt.u32.totalorder %s2608_s20, %s2264_s30 }
 0x342   : > { %p2270_p9 = scmp.lt.u32.totalorder %s2264_s30, %s798_s15 }
 0x343   : > { %p2269_p10 = por %p2268_p2, %p2267_p8 }
 0x345   : > { %p2271_p0 = por %p2270_p9, %p2269_p10 }
 0x347   : > { %p2272_p4 = pnand %p2271_p0, %p2265_p13 }
 0x349   : > { %2275 = shalt.err (!%p2272_p4)  }
 0x34a   : > { %s2276_s14 = scalar_lea.vmem %s3302_s10, 16  ;;  %p2281_p3 = scmp.lt.s32.totalorder %s3302_s10, %s2587_s28 }
 0x34b   : > { %p2277_p6 = scmp.ne.s32.totalorder %s3302_s10, %s2276_s14  ;;  %p2282_p11 = scmp.lt.s32.totalorder %s2619_s13, %s2276_s14 }
 0x34d   : > { %p2283_p12 = por %p2282_p11, %p2281_p3 }
 0x34f   : > { %p2284_p1 = pnand %p2283_p12, %p2277_p6 }
 0x351   : > { %2287 = shalt.err (!%p2284_p1)  }
 0x352   : > { %810 = dma.hbm_to_vmem [thread:$0]  %s798_s15, 16, %s3302_s10, %s3066_s11 }
 0x353   : > { %s1284_s0 = sshll.u32 %s812_s26, 4 }
 0x354   : > { %s815_s29 = scalar_lea.hbm %s3429_s1, %s1284_s0 }
 0x355   : > { %s2288_s27 = scalar_lea.hbm %s815_s29, 16  ;;  %p2291_p7 = scmp.lt.u32.totalorder %s815_s29, %s3429_s1 }
 0x356   : > { %p2289_p5 = scmp.ne.s32.totalorder %s815_s29, %s2288_s27  ;;  %p2292_p13 = scmp.lt.u32.totalorder %s2608_s20, %s2288_s27 }
 0x357   : > { %p2294_p2 = scmp.lt.u32.totalorder %s2288_s27, %s815_s29 }
 0x358   : > { %p2293_p8 = por %p2292_p13, %p2291_p7 }
 0x35a   : > { %p2295_p10 = por %p2294_p2, %p2293_p8 }
 0x35c   : > { %p2296_p9 = pnand %p2295_p10, %p2289_p5 }
 0x35e   : > { %2299 = shalt.err (!%p2296_p9)  }
 0x35f   : > { %s2300_s19 = scalar_lea.vmem %s825_s23, 16  ;;  %p2305_p4 = scmp.lt.s32.totalorder %s825_s23, %s2587_s28 }
 0x360   : > { %p2301_p0 = scmp.ne.s32.totalorder %s825_s23, %s2300_s19  ;;  %p2306_p6 = scmp.lt.s32.totalorder %s2619_s13, %s2300_s19 }
 0x362   : > { %p2307_p3 = por %p2306_p6, %p2305_p4 }
 0x364   : > { %p2308_p11 = pnand %p2307_p3, %p2301_p0 }
 0x366   : > { %2311 = shalt.err (!%p2308_p11)  }
 0x367   : > { %827 = dma.hbm_to_vmem [thread:$0]  %s815_s29, 16, %s825_s23, %s3066_s11 }
 0x368 PF: > { %s1286_s20 = sshll.u32 %s2570_s22, 4  ;;  %s830_s26 = scalar_lea.sflag [#allocation3], %s2570_s22 }
 0x369   : > { %s3337_s10 = scalar_lea.vmem [#allocation2], %s1286_s20 }
 0x36a   : > { %2370 = dma.done.wait %s830_s26, 256 }
 0x36b   : > { %2371 = vsyncadd %s830_s26, 4294967040  ;;  %v2420_v0 = vmov 0   ;;  %v859_v1 = vld [vmem:[%s2579_s21] sm:$0xff]  ;;  %v860_v2 = vld [vmem:[%s2579_s21 + $0x8] sm:$0xff]  ;;  %v878_v5 = vlaneseq  ;;  %s3476_s24 = sld [smem:[#allocation105_spill]]  ;;  %s3477_s7 = sld [smem:[#allocation97_spill]] }
 0x36c   : > { %1435 = vset.pattern.permute.xlu0 %v2420_v0  ;;  %v861_v3 = vcvt.s32.f32 %v859_v1  ;;  %v862_v4 = vcvt.s32.f32 %v860_v2  ;;  %v858_v6 = vld [vmem:[%s3431_s3] sm:$0xf]  ;;  %v835_v26 = vld [vmem:[%s3337_s10 + $0x8] sm:$0xff]  ;;  %s3478_s17 = sld [smem:[#allocation102_spill]]  ;;  %s1296_s15 = sshll.u32 %s2390_s8, 9 }
 0x36d   : > { %v879_v7 = vshrl.u32 %v878_v5, 7  ;;  %v864_v8 = vrot.slane %v858_v6, 7  ;;  %v834_v16 = vld [vmem:[%s3337_s10] sm:$0xff]  ;;  %v837_v27 = vld [vmem:[#allocation6 + $0x8] sm:$0xff]  ;;  %v839_v31 = vshll.u32 %v835_v26, 16  ;;  %v843_v32 = vand.u32 4294901760, %v835_v26 }
 0x36e   : > { %869 = vperm.xlu0 %1435, %v861_v3   ;;  %v836_v17 = vld [vmem:[#allocation6] sm:$0xff]  ;;  %v838_v20 = vshll.u32 %v834_v16, 16  ;;  %v842_v21 = vand.u32 4294901760, %v834_v16  ;;  %v847_v33 = vshll.u32 %v837_v27, 16  ;;  %v851_v34 = vand.u32 4294901760, %v837_v27  ;;  %s3479_s25 = sld [smem:[#allocation108_spill]] }
 0x36f   : > { %v3345_v9 = vsub.s32 1, %v879_v7  ;;  %v884_v10 = vsub.s32 3, %v879_v7  ;;  %v866_v11 = vsub.f32 %v858_v6, %v864_v8  ;;  %v3347_v12 = vsub.s32 0, %v879_v7  ;;  %s2421_s4 = smov [#allocation9]  }
 0x370   : > { %v906_v13 = vsub.s32 2, %v879_v7  ;;  %v846_v24 = vshll.u32 %v836_v17, 16  ;;  %v850_v25 = vand.u32 4294901760, %v836_v17  ;;  %v855_v42 = vadd.f32 %v847_v33, %v839_v31  ;;  %s2316_s29 = sshll.u32 %s2421_s4, 4  ;;  %s2317_s29 = int_to_ptr.vmem [resolvable:$false] %s2316_s29 }
 0x371   : > { %v881_v14 = vrot.slane %v866_v11, %v3345_v9  ;;  %v885_v15 = vrot.slane %v866_v11, %v884_v10  ;;  %v903_v18 = vrot.slane %v858_v6, %v3347_v12  ;;  %v857_v43 = vadd.f32 %v851_v34, %v843_v32  ;;  %v959_v11 = vld [vmem:[%s3433_s5] sm:$0x3]  ;;  %s1011_s23 = sshll.u32 %s3476_s24, 4  ;;  %s3480_s8 = sand.u32 1, %s3477_s7   ;;  %s3376_s23 = int_to_ptr.vmem [resolvable:$true] %s1011_s23 }
 0x372   : > { %874 = vperm.xlu0 %1435, %v862_v4   ;;  %v907_v19 = vrot.slane %v858_v6, %v906_v13  ;;  %v854_v37 = vadd.f32 %v846_v24, %v838_v20  ;;  %v856_v38 = vadd.f32 %v850_v25, %v842_v21  ;;  %v975_v13 = vld [vmem:[%s3434_s6] sm:$0x3]  ;;  %s3382_s0 = scalar_lea.sflag [#allocation8], %s3480_s8  ;;  %s2312_s2 = scalar_lea.vmem %s3376_s23, 512 }
 0x373   : > { %v891_v22 = vrot.slane %v881_v14, %v3345_v9  ;;  %v895_v23 = vrot.slane %v885_v15, %v3345_v9  ;;  %v913_v28 = vrot.slane %v903_v18, %v3347_v12  ;;  %v964_v14 = vrot.slane %v959_v11, %v3347_v12  ;;  %p2313_p12 = scmp.ne.s32.totalorder %s3376_s23, %s2312_s2  ;;  %p3481_p1 = scmp.ne.s32.totalorder %s3478_s17, 0 }
 0x374   : > { %v917_v29 = vrot.slane %v907_v19, %v3347_v12  ;;  %v968_v15 = vrot.slane %v959_v11, %v3345_v9  ;;  %v980_v17 = vrot.slane %v975_v13, %v3347_v12  ;;  %v984_v18 = vrot.slane %v975_v13, %v3345_v9  ;;  %s3374_s14 = scalar_lea.hbm %s3479_s25, %s1296_s15  ;;  %s2318_s27 = scalar_lea.vmem %s2317_s29, 1024 }
 0x375   : > { %p2314_p5 = pnand %p2313_p12, %p3481_p1  ;;  %p2319_p13 = scmp.lt.s32.totalorder %s3376_s23, %s2317_s29 }
 0x376   : > { %p2320_p8 = scmp.lt.s32.totalorder %s2318_s27, %s2312_s2 }
 0x377   : > { %p2315_p7 = pneg %p2314_p5 }
 0x378   : > { %p2321_p2 = por %p2320_p8, %p2319_p13 }
 0x37a   : > { %p2322_p10 = pnand %p2321_p2, %p2315_p7 }
 0x3ed   : > { %v870_v30 = vpop.permute.xlu0 %869 }
 0x3ee   : > { %v896_v35 = vmul.f32 %v891_v22, %v870_v30  ;;  %v897_v36 = vmul.f32 %v895_v23, %v870_v30 }
 0x3f0   : > { %v918_v39 = vadd.f32 %v913_v28, %v896_v35  ;;  %v919_v40 = vadd.f32 %v917_v29, %v897_v36 }
 0x3f1   : > { %v875_v41 = vpop.permute.xlu0 %874 }
 0x3f2   : > { %v898_v44 = vmul.f32 %v891_v22, %v875_v41  ;;  %v899_v45 = vmul.f32 %v895_v23, %v875_v41  ;;  %v922_v46 = vadd.f32 %v918_v39, %v854_v37  ;;  %v923_v47 = vadd.f32 %v919_v40, %v856_v38 }
 0x3f4   : > { %v920_v48 = vadd.f32 %v913_v28, %v898_v44  ;;  %v921_v49 = vadd.f32 %v917_v29, %v899_v45  ;;  %v926_v50 = vadd.f32 %v923_v47, %v922_v46 }
 0x3f6   : > { %927 = vadd.xlane.f32.xlu1 %v926_v50  ;;  %v924_v51 = vadd.f32 %v920_v48, %v855_v42  ;;  %v925_v52 = vadd.f32 %v921_v49, %v857_v43 }
 0x3f8   : > { %v929_v53 = vadd.f32 %v925_v52, %v924_v51 }
 0x3fa   : > { %930 = vadd.xlane.f32.xlu1 %v929_v53 }
 0x483   : > { %v928_v54 = vpop.xlane.xlu1 %927 }
 0x484   : > { %v933_v55 = vmul.f32 0.00390625, %v928_v54 }
 0x486   : > { %v935_v56 = vsub.f32 %v922_v46, %v933_v55  ;;  %v936_v57 = vsub.f32 %v923_v47, %v933_v55 }
 0x487   : > { %v931_v58 = vpop.xlane.xlu1 %930 }
 0x488   : > { %v934_v59 = vmul.f32 0.00390625, %v931_v58  ;;  %v939_v60 = vmul.f32 %v935_v56, %v935_v56  ;;  %v940_v61 = vmul.f32 %v936_v57, %v936_v57 }
 0x48a   : > { %v937_v62 = vsub.f32 %v924_v51, %v934_v59  ;;  %v938_v63 = vsub.f32 %v925_v52, %v934_v59  ;;  %v943_v0 = vadd.f32 %v940_v61, %v939_v60 }
 0x48c   : > { %944 = vadd.xlane.f32.xlu0 %v943_v0  ;;  %v941_v1 = vmul.f32 %v937_v62, %v937_v62  ;;  %v942_v2 = vmul.f32 %v938_v63, %v938_v63 }
 0x48e   : > { %v946_v3 = vadd.f32 %v942_v2, %v941_v1 }
 0x490   : > { %947 = vadd.xlane.f32.xlu1 %v946_v3 }
 0x519   : > { %v945_v4 = vpop.xlane.xlu0 %944 }
 0x51a   : > { %v949_v5 = vmul.f32 0.00390625, %v945_v4 }
 0x51c   : > { %v951_v6 = vadd.f32 1e-12, %v949_v5 }
 0x51d   : > { %v948_v7 = vpop.xlane.xlu1 %947 }
 0x51e   : > { %1436 = vrsqrt.f32 %v951_v6  ;;  %v950_v8 = vmul.f32 0.00390625, %v948_v7 }
 0x520   : > { %v952_v10 = vadd.f32 1e-12, %v950_v8 }
 0x522   : > { %1438 = vrsqrt.f32 %v952_v10 }
 0x528   : > { %v1437_v16 = vpop.eup %1436 }
 0x529   : > { %v955_v19 = vmul.f32 %v1437_v16, %v935_v56  ;;  %v956_v20 = vmul.f32 %v1437_v16, %v936_v57 }
 0x52b   : > { %v971_v21 = vmul.f32 %v964_v14, %v955_v19  ;;  %v972_v22 = vmul.f32 %v968_v15, %v956_v20 }
 0x52c   : > { %v1439_v23 = vpop.eup %1438 }
 0x52d   : > { %v987_v24 = vadd.f32 %v980_v17, %v971_v21  ;;  %v988_v25 = vadd.f32 %v984_v18, %v972_v22  ;;  %v957_v26 = vmul.f32 %v1439_v23, %v937_v62  ;;  %v958_v27 = vmul.f32 %v1439_v23, %v938_v63 }
 0x52f   : > { %991 = vst [vmem:[%s3476_s24] sm:$0xff] %v987_v24  ;;  %992 = vst [vmem:[%s3476_s24 + $0x8] sm:$0xff] %v988_v25  ;;  %v973_v12 = vmul.f32 %v964_v14, %v957_v26  ;;  %v974_v28 = vmul.f32 %v968_v15, %v958_v27 }
 0x531   : > { %v989_v9 = vadd.f32 %v980_v17, %v973_v12  ;;  %v990_v29 = vadd.f32 %v984_v18, %v974_v28 }
 0x533   : > { %993 = vst [vmem:[%s3476_s24 + $0x10] sm:$0xff] %v989_v9  ;;  %994 = vst [vmem:[%s3476_s24 + $0x18] sm:$0xff] %v990_v29 }
 0x534   : > { %2325 = shalt.err (!%p2322_p10)
}
 0x535   : > { %s2326_s12 = scalar_lea.hbm %s3374_s14, 512  ;;  %s2330_s20 = scalar_lea.hbm %s3479_s25, 1024 }
 0x536   : > { %p2327_p9 = scmp.ne.s32.totalorder %s3374_s14, %s2326_s12  ;;  %p2331_p6 = scmp.lt.u32.totalorder %s3374_s14, %s3479_s25 }
 0x537   : > { %p2332_p3 = scmp.lt.u32.totalorder %s2330_s20, %s2326_s12  ;;  %p2334_p12 = scmp.lt.u32.totalorder %s2326_s12, %s3374_s14 }
 0x538   : > { %p2328_p0 = pnand %p2327_p9, %p3481_p1 }
 0x539   : > { %p2333_p11 = por %p2332_p3, %p2331_p6 }
 0x53a   : > { %p2329_p4 = pneg %p2328_p0 }
 0x53b   : > { %p2335_p5 = por %p2334_p12, %p2333_p11 }
 0x53d   : > { %p2336_p7 = pnand %p2335_p5, %p2329_p4 }
 0x53f   : > { %2339 = shalt.err (!%p2336_p7)
}
 0x540   : > { %s2422_s28 = smov 256   ;;  %s2423_s13 = smov 16  }
 0x541   : > { %1350 = dma.vmem_to_hbm [thread:$0]  (%p3481_p1), %s3376_s23, 512, %s3374_s14, %s3382_s0, %s2422_s28, %s2422_s28, %s2423_s13  }
 0x542 PF: > { %s3482_s22 = sld [smem:[#allocation100_spill]]  ;;  %s3483_s21 = sld [smem:[#allocation96_spill]] }
 0x543   : > { %s3484_s11 = sld [smem:[#allocation103_spill]] }
 0x548   : > { %p1363_p13 = scmp.ge.s32.totalorder %s3482_s22, 2  ;;  %s1026_s18 = sand.u32 1, %s3483_s21  }
 0x549   : > { %p3485_p8 = scmp.ne.s32.totalorder %s3484_s11, 0  ;;  %s1027_s24 = scalar_lea.sflag [#allocation8], %s1026_s18 }
 0x54b   : > { %p1357_p2 = pnand %p1363_p13, %p3485_p8 }
 0x54d   : > { %2373 = dma.done.wait (!%p1357_p2), %s1027_s24, 512  }
 0x54e   : > { %2375 = vsyncadd (!%p1357_p2), %s1027_s24, 4294966784  ;;  %s27_s10 = sadd.s32 1, %s3482_s22   ;;  %s3486_s29 = sld [smem:[#allocation97_spill]] }
 0x54f   : > { %p24_p10 = scmp.ge.s32.totalorder %s27_s10, 4   ;;  %s3487_s30 = sld [smem:[#allocation98_spill]] }
 0x550   : > { %s3488_s0 = sld [smem:[#allocation104_spill]]  ;;  %s3489_s8 = sld [smem:[#allocation99_spill]] }
 0x551   : > { %s3490_s9 = sld [smem:[#allocation101_spill]]  ;;  %26 = sbr.rel (!%p24_p10) target bundleno = 21 (0x15), region = 284 }
 0x558   :  { %1032 = vsyncpa [#allocation7], 1 }
 0x559   :  { %1034 = vsyncpa [#allocation7 + $0x1], 1 }
 0x55a   :  { %1035 = vsyncpa [#allocation8], 1 }
 0x55b   :  { %1037 = vsyncpa [#allocation8 + $0x1], 1 }
 0x55c   :  { %1038 = vsyncmov [#allocation3] }
 0x55f   :  { %s1039_s7 = vpop.sfrf %1038 }
 0x560   :  { %p1293_p1 = scmp.ne.s32.totalorder %s1039_s7, 0 }
 0x562   :  { %1043 = shalt.err (%p1293_p1)  }
 0x563   :  { %1045 = vsyncmov [#allocation3 + $0x1] }
 0x566   :  { %s1046_s17 = vpop.sfrf %1045 }
 0x567   :  { %p1294_p9 = scmp.ne.s32.totalorder %s1046_s17, 0 }
 0x569   :  { %1050 = shalt.err (%p1294_p9)  }

</bundles_post_ra>
